<compile_context>
chip_gen: v6e
topology: v6e:2x2x1
jax: 0.10.0
libtpu: 0.0.40
codegen_flags: <defaults>
</compile_context>

<pallas_src>
import math

import jax
import jax.numpy as jnp
from jax import lax
from jax.experimental import pallas as pl
from jax.experimental.pallas import tpu as pltpu

# Model hyper-parameters (small, but consistent with NoPEModelArgs semantics:
# head_dim = dim // n_heads, FFN hidden_dim = dim, multiple_of = 1).
DIM = 128
N_HEADS = 4
HEAD_DIM = DIM // N_HEADS
HIDDEN = DIM          # FeedForward(dim=dim, hidden_dim=dim, multiple_of=1)
EPS = 1e-5            # args.norm_eps
B = 2
S = 16


def _rmsnorm(x, w, eps):
    # x: (T, D) f32, w: (1, D) f32 (sublane-broadcast read)
    ms = jnp.mean(x * x, axis=-1, keepdims=True)
    return x * lax.rsqrt(ms + eps) * w


def transformer_block_kernel(x_ref, mask_ref, wqkv_ref, wo_ref, w13_ref, w2_ref,
                             attn_norm_ref, ffn_norm_ref, o_ref):
    T, D = x_ref.shape
    G, HD, _ = wqkv_ref.shape          # G = 3 * n_heads, HD = head_dim
    H = G // 3
    HID = w13_ref.shape[1] // 2

    x = x_ref[...]                      # (T, D) f32
    mask = mask_ref[...]                # (T, T) additive block-diag causal mask

    # Weights arrive in bf16 (halved DMA bytes); compute stays f32.
    wqkv = wqkv_ref[...].astype(jnp.float32)   # (3H, HD, D)
    wo = wo_ref[...].astype(jnp.float32)       # (H, HD, D)
    w13 = w13_ref[...].astype(jnp.float32)     # (D, 2*HID)
    w2 = w2_ref[...].astype(jnp.float32)       # (HID, D)

    # ---------------- attention ----------------
    hn = _rmsnorm(x, attn_norm_ref[...], EPS)               # (T, D)
    # Fused, head-batched Q/K/V projection: one batched einsum, heads on the
    # leading (major) axis -> no 32-lane sub-vreg extracts.
    hn_b = jnp.broadcast_to(hn[None], (G, T, D))            # cheap leading bcast
    qkv = jnp.einsum('gtc,gkc->gtk', hn_b, wqkv,
                     preferred_element_type=jnp.float32)    # (3H, T, HD)
    q = qkv[:H]                                             # (H, T, HD)
    k = qkv[H:2 * H]
    v = qkv[2 * H:]

    scale = 1.0 / math.sqrt(HD)
    s = jnp.einsum('hqd,hkd->hqk', q, k,
                   preferred_element_type=jnp.float32) * scale   # (H, T, T)
    s = s + mask[None]
    s = s - jnp.max(s, axis=-1, keepdims=True)
    p = jnp.exp(s)                                               # f32 softmax
    p = p * pl.reciprocal(jnp.sum(p, axis=-1, keepdims=True), approx=True)
    ctx = jnp.einsum('hqk,hkd->hqd', p, v,
                     preferred_element_type=jnp.float32)         # (H, T, HD)
    # Per-head output projection accumulated over heads (no lane concatenate).
    attn = jnp.sum(jnp.einsum('hqd,hde->hqe', ctx, wo,
                              preferred_element_type=jnp.float32), axis=0)
    h = x + attn

    # ---------------- SwiGLU feed-forward ----------------
    fn = _rmsnorm(h, ffn_norm_ref[...], EPS)
    gu = jnp.dot(fn, w13, preferred_element_type=jnp.float32)   # (T, 2*HID)
    g = jax.nn.silu(gu[:, :HID])                                # lane-aligned
    u = gu[:, HID:]
    ff = jnp.dot(g * u, w2, preferred_element_type=jnp.float32)

    o_ref[...] = h + ff


def transformer_block(x, mask, params):
    """x: (B, S, D) f32; mask: (S, S) additive f32; params: (wq, wk, wv, wo,
    w1, w2, w3, attn_norm_w, ffn_norm_w) with linear weights in (in, out)
    layout (PyTorch weight transposed), stored in bf16."""
    wq, wk, wv, wo, w1, w2, w3, attn_norm_w, ffn_norm_w = params
    bsz, seqlen, dim = x.shape
    T = bsz * seqlen
    hd = dim // N_HEADS

    # ---- host-side layout plumbing (free w.r.t. the kernel) ----
    def per_head(w):                                    # (D, D) -> (H, HD, D)
        return jnp.transpose(w.reshape(dim, N_HEADS, hd), (1, 2, 0))

    wqkv = jnp.concatenate([per_head(wq), per_head(wk), per_head(wv)], axis=0)
    wo3 = wo.reshape(N_HEADS, hd, dim)                  # (H, HD, D)
    w13 = jnp.concatenate([w1, w3], axis=1)             # (D, 2*HIDDEN)

    x2d = x.reshape(T, dim)
    # Block-diagonal causal mask so batch can be flattened into one slab.
    big_mask = jnp.full((T, T), -1e9, dtype=jnp.float32)
    for b in range(bsz):
        big_mask = big_mask.at[b * seqlen:(b + 1) * seqlen,
                               b * seqlen:(b + 1) * seqlen].set(mask)

    vmem = pl.BlockSpec(memory_space=pltpu.MemorySpace.VMEM)
    out2d = pl.pallas_call(
        transformer_block_kernel,
        out_shape=jax.ShapeDtypeStruct((T, dim), jnp.float32),
        in_specs=[vmem] * 8,
        out_specs=vmem,
    )(x2d, big_mask, wqkv, wo3, w13, w2, attn_norm_w, ffn_norm_w)
    return out2d.reshape(bsz, seqlen, dim)


def reference_block(x, mask, params):
    """Pure-JAX reference mirroring the PyTorch forward (f32 math)."""
    wq, wk, wv, wo, w1, w2, w3, an, fn = [p.astype(jnp.float32) for p in params]

    def rmsnorm(v, w):
        ms = jnp.mean(v * v, axis=-1, keepdims=True)
        return v * lax.rsqrt(ms + EPS) * w

    bsz, seqlen, dim = x.shape
    hn = rmsnorm(x, an)
    q = (hn @ wq).reshape(bsz, seqlen, N_HEADS, HEAD_DIM).transpose(0, 2, 1, 3)
    k = (hn @ wk).reshape(bsz, seqlen, N_HEADS, HEAD_DIM).transpose(0, 2, 1, 3)
    v = (hn @ wv).reshape(bsz, seqlen, N_HEADS, HEAD_DIM).transpose(0, 2, 1, 3)
    scores = jnp.einsum("bhqd,bhkd->bhqk", q, k) / math.sqrt(HEAD_DIM) + mask
    p = jax.nn.softmax(scores, axis=-1)
    out = jnp.einsum("bhqk,bhkd->bhqd", p, v)
    out = out.transpose(0, 2, 1, 3).reshape(bsz, seqlen, dim) @ wo
    h = x + out
    fnorm = rmsnorm(h, fn)
    ff = (jax.nn.silu(fnorm @ w1) * (fnorm @ w3)) @ w2
    return h + ff


if __name__ == "__main__":
    key = jax.random.PRNGKey(0)
    ks = jax.random.split(key, 9)

    def winit(k, shape):
        # (in, out) layout == PyTorch nn.Linear weight transposed.
        # Stored in bf16 to halve HBM->VMEM weight DMA; both the kernel and the
        # reference consume the same bf16-rounded values, so the comparison only
        # measures in-kernel (f32) math differences.
        return (0.02 * jax.random.normal(k, shape)).astype(jnp.bfloat16)

    wq = winit(ks[0], (DIM, DIM))
    wk = winit(ks[1], (DIM, DIM))
    wv = winit(ks[2], (DIM, DIM))
    wo = winit(ks[3], (DIM, DIM))
    w1 = winit(ks[4], (DIM, HIDDEN))
    w2 = winit(ks[5], (HIDDEN, DIM))
    w3 = winit(ks[6], (DIM, HIDDEN))
    attn_norm_w = jnp.ones((1, DIM), jnp.float32)   # RMSNorm init = ones
    ffn_norm_w = jnp.ones((1, DIM), jnp.float32)
    params = (wq, wk, wv, wo, w1, w2, w3, attn_norm_w, ffn_norm_w)

    x = jax.random.normal(ks[7], (B, S, DIM), dtype=jnp.float32)
    # Causal additive mask (large negative instead of -inf for numerical safety).
    i = jnp.arange(S)[:, None]
    j = jnp.arange(S)[None, :]
    mask = jnp.where(j <= i, 0.0, -1e9).astype(jnp.float32)

    out = jax.block_until_ready(transformer_block(x, mask, params))
    ref = reference_block(x, mask, params)

    assert out.shape == (B, S, DIM)
    # 2e-3 tolerance: identical (bf16-rounded) weights on both sides; the only
    # deltas are f32 reassociation and the approximate softmax reciprocal.
    assert jnp.allclose(out, ref, atol=2e-3, rtol=2e-3), "mismatch vs JAX reference"

    print("KERNEL_OK")
</pallas_src>

<mosaic_0001>
module attributes {stable_mosaic.version = 11 : i64} {
  func.func @transformer_block_kernel(%arg0: memref<32x128xf32, #tpu.memory_space<vmem>>, %arg1: memref<32x32xf32, #tpu.memory_space<vmem>>, %arg2: memref<12x32x128xbf16, #tpu.memory_space<vmem>>, %arg3: memref<4x32x128xbf16, #tpu.memory_space<vmem>>, %arg4: memref<128x256xbf16, #tpu.memory_space<vmem>>, %arg5: memref<128x128xbf16, #tpu.memory_space<vmem>>, %arg6: memref<1x128xf32, #tpu.memory_space<vmem>>, %arg7: memref<1x128xf32, #tpu.memory_space<vmem>>, %arg8: memref<32x128xf32, #tpu.memory_space<vmem>>) attributes {dimension_semantics = [], scalar_prefetch = 0 : i64, scratch_operands = 0 : i64, tpu.core_type = #tpu.core_type<tc>} {
    %c0 = arith.constant 0 : index
    %c0_0 = arith.constant 0 : index
    %0 = vector.load %arg0[%c0, %c0_0] : memref<32x128xf32, #tpu.memory_space<vmem>>, vector<32x128xf32>
    %c0_1 = arith.constant 0 : index
    %c0_2 = arith.constant 0 : index
    %1 = vector.load %arg1[%c0_1, %c0_2] : memref<32x32xf32, #tpu.memory_space<vmem>>, vector<32x32xf32>
    %c0_3 = arith.constant 0 : index
    %c0_4 = arith.constant 0 : index
    %c0_5 = arith.constant 0 : index
    %2 = vector.load %arg2[%c0_3, %c0_4, %c0_5] : memref<12x32x128xbf16, #tpu.memory_space<vmem>>, vector<12x32x128xbf16>
    %3 = arith.extf %2 : vector<12x32x128xbf16> to vector<12x32x128xf32>
    %c0_6 = arith.constant 0 : index
    %c0_7 = arith.constant 0 : index
    %c0_8 = arith.constant 0 : index
    %4 = vector.load %arg3[%c0_6, %c0_7, %c0_8] : memref<4x32x128xbf16, #tpu.memory_space<vmem>>, vector<4x32x128xbf16>
    %5 = arith.extf %4 : vector<4x32x128xbf16> to vector<4x32x128xf32>
    %c0_9 = arith.constant 0 : index
    %c0_10 = arith.constant 0 : index
    %6 = vector.load %arg4[%c0_9, %c0_10] : memref<128x256xbf16, #tpu.memory_space<vmem>>, vector<128x256xbf16>
    %7 = arith.extf %6 : vector<128x256xbf16> to vector<128x256xf32>
    %c0_11 = arith.constant 0 : index
    %c0_12 = arith.constant 0 : index
    %8 = vector.load %arg5[%c0_11, %c0_12] : memref<128x128xbf16, #tpu.memory_space<vmem>>, vector<128x128xbf16>
    %9 = arith.extf %8 : vector<128x128xbf16> to vector<128x128xf32>
    %c0_13 = arith.constant 0 : index
    %c0_14 = arith.constant 0 : index
    %10 = vector.load %arg6[%c0_13, %c0_14] : memref<1x128xf32, #tpu.memory_space<vmem>>, vector<1x128xf32>
    %11 = arith.mulf %0, %0 : vector<32x128xf32>
    %cst = arith.constant dense<0.000000e+00> : vector<32xf32>
    %12 = vector.multi_reduction <add>, %11, %cst [1] : vector<32x128xf32> to vector<32xf32>
    %13 = vector.shape_cast %12 : vector<32xf32> to vector<32x1xf32>
    %cst_15 = arith.constant 1.280000e+02 : f32
    %14 = vector.broadcast %cst_15 : f32 to vector<32x1xf32>
    %15 = arith.divf %13, %14 : vector<32x1xf32>
    %cst_16 = arith.constant 9.99999974E-6 : f32
    %16 = vector.broadcast %cst_16 : f32 to vector<32x1xf32>
    %17 = arith.addf %15, %16 : vector<32x1xf32>
    %18 = math.rsqrt %17 : vector<32x1xf32>
    %19 = vector.broadcast %18 : vector<32x1xf32> to vector<32x128xf32>
    %20 = arith.mulf %0, %19 : vector<32x128xf32>
    %21 = vector.broadcast %10 : vector<1x128xf32> to vector<32x128xf32>
    %22 = arith.mulf %20, %21 : vector<32x128xf32>
    %23 = vector.shape_cast %22 : vector<32x128xf32> to vector<1x32x128xf32>
    %24 = vector.shape_cast %23 : vector<1x32x128xf32> to vector<1x32x128xf32>
    %25 = vector.broadcast %24 : vector<1x32x128xf32> to vector<12x32x128xf32>
    "tpu.trace_start"() <{level = 10 : i32, message = "gtc,gkc->gtk"}> : () -> ()
    %cst_17 = arith.constant dense<0.000000e+00> : vector<12x32x32xf32>
    %26 = tpu.matmul %25, %3, %cst_17 {dimension_numbers = #tpu.dot_dimension_numbers<[2], [2], [1], [1], [0, 0, 0, 1, 1, 1], [0], [0]>} : vector<12x32x128xf32>, vector<12x32x128xf32>, vector<12x32x32xf32> -> vector<12x32x32xf32>
    "tpu.trace_stop"() : () -> ()
    %27 = vector.extract_strided_slice %26 {offsets = [0, 0, 0], sizes = [4, 32, 32], strides = [1, 1, 1]} : vector<12x32x32xf32> to vector<4x32x32xf32>
    %28 = vector.extract_strided_slice %26 {offsets = [4, 0, 0], sizes = [4, 32, 32], strides = [1, 1, 1]} : vector<12x32x32xf32> to vector<4x32x32xf32>
    %29 = vector.extract_strided_slice %26 {offsets = [8, 0, 0], sizes = [4, 32, 32], strides = [1, 1, 1]} : vector<12x32x32xf32> to vector<4x32x32xf32>
    "tpu.trace_start"() <{level = 10 : i32, message = "hqd,hkd->hqk"}> : () -> ()
    %cst_18 = arith.constant dense<0.000000e+00> : vector<4x32x32xf32>
    %30 = tpu.matmul %27, %28, %cst_18 {dimension_numbers = #tpu.dot_dimension_numbers<[2], [2], [1], [1], [0, 0, 0, 1, 1, 1], [0], [0]>} : vector<4x32x32xf32>, vector<4x32x32xf32>, vector<4x32x32xf32> -> vector<4x32x32xf32>
    "tpu.trace_stop"() : () -> ()
    %cst_19 = arith.constant 0.176776692 : f32
    %31 = vector.broadcast %cst_19 : f32 to vector<4x32x32xf32>
    %32 = arith.mulf %30, %31 : vector<4x32x32xf32>
    %33 = vector.shape_cast %1 : vector<32x32xf32> to vector<1x32x32xf32>
    %34 = vector.broadcast %33 : vector<1x32x32xf32> to vector<4x32x32xf32>
    %35 = arith.addf %32, %34 : vector<4x32x32xf32>
    %cst_20 = arith.constant dense<0xFF800000> : vector<4x32xf32>
    %36 = vector.multi_reduction <maximumf>, %35, %cst_20 [2] : vector<4x32x32xf32> to vector<4x32xf32>
    %37 = vector.shape_cast %36 : vector<4x32xf32> to vector<4x32x1xf32>
    %38 = vector.broadcast %37 : vector<4x32x1xf32> to vector<4x32x32xf32>
    %39 = arith.subf %35, %38 : vector<4x32x32xf32>
    %40 = math.exp %39 : vector<4x32x32xf32>
    %cst_21 = arith.constant dense<0.000000e+00> : vector<4x32xf32>
    %41 = vector.multi_reduction <add>, %40, %cst_21 [2] : vector<4x32x32xf32> to vector<4x32xf32>
    %42 = vector.shape_cast %41 : vector<4x32xf32> to vector<4x32x1xf32>
    %43 = tpu.reciprocal %42 {approx = true} : vector<4x32x1xf32> -> vector<4x32x1xf32>
    %44 = vector.broadcast %43 : vector<4x32x1xf32> to vector<4x32x32xf32>
    %45 = arith.mulf %40, %44 : vector<4x32x32xf32>
    "tpu.trace_start"() <{level = 10 : i32, message = "hqk,hkd->hqd"}> : () -> ()
    %cst_22 = arith.constant dense<0.000000e+00> : vector<4x32x32xf32>
    %46 = tpu.matmul %45, %29, %cst_22 {dimension_numbers = #tpu.dot_dimension_numbers<[2], [1], [1], [2], [0, 0, 0, 1, 1, 2], [0], [0]>} : vector<4x32x32xf32>, vector<4x32x32xf32>, vector<4x32x32xf32> -> vector<4x32x32xf32>
    "tpu.trace_stop"() : () -> ()
    "tpu.trace_start"() <{level = 10 : i32, message = "hqd,hde->hqe"}> : () -> ()
    %cst_23 = arith.constant dense<0.000000e+00> : vector<4x32x128xf32>
    %47 = tpu.matmul %46, %5, %cst_23 {dimension_numbers = #tpu.dot_dimension_numbers<[2], [1], [1], [2], [0, 0, 0, 1, 1, 2], [0], [0]>} : vector<4x32x32xf32>, vector<4x32x128xf32>, vector<4x32x128xf32> -> vector<4x32x128xf32>
    "tpu.trace_stop"() : () -> ()
    %cst_24 = arith.constant dense<0.000000e+00> : vector<32x128xf32>
    %48 = vector.multi_reduction <add>, %47, %cst_24 [0] : vector<4x32x128xf32> to vector<32x128xf32>
    %49 = arith.addf %0, %48 : vector<32x128xf32>
    %c0_25 = arith.constant 0 : index
    %c0_26 = arith.constant 0 : index
    %50 = vector.load %arg7[%c0_25, %c0_26] : memref<1x128xf32, #tpu.memory_space<vmem>>, vector<1x128xf32>
    %51 = arith.mulf %49, %49 : vector<32x128xf32>
    %cst_27 = arith.constant dense<0.000000e+00> : vector<32xf32>
    %52 = vector.multi_reduction <add>, %51, %cst_27 [1] : vector<32x128xf32> to vector<32xf32>
    %53 = vector.shape_cast %52 : vector<32xf32> to vector<32x1xf32>
    %cst_28 = arith.constant 1.280000e+02 : f32
    %54 = vector.broadcast %cst_28 : f32 to vector<32x1xf32>
    %55 = arith.divf %53, %54 : vector<32x1xf32>
    %cst_29 = arith.constant 9.99999974E-6 : f32
    %56 = vector.broadcast %cst_29 : f32 to vector<32x1xf32>
    %57 = arith.addf %55, %56 : vector<32x1xf32>
    %58 = math.rsqrt %57 : vector<32x1xf32>
    %59 = vector.broadcast %58 : vector<32x1xf32> to vector<32x128xf32>
    %60 = arith.mulf %49, %59 : vector<32x128xf32>
    %61 = vector.broadcast %50 : vector<1x128xf32> to vector<32x128xf32>
    %62 = arith.mulf %60, %61 : vector<32x128xf32>
    %cst_30 = arith.constant dense<0.000000e+00> : vector<32x256xf32>
    %63 = tpu.matmul %62, %7, %cst_30 {dimension_numbers = #tpu.dot_dimension_numbers<[1], [0], [0], [1], [0, 0, 1, 1], [], []>} : vector<32x128xf32>, vector<128x256xf32>, vector<32x256xf32> -> vector<32x256xf32>
    %64 = vector.extract_strided_slice %63 {offsets = [0, 0], sizes = [32, 128], strides = [1, 1]} : vector<32x256xf32> to vector<32x128xf32>
    %65 = arith.negf %64 : vector<32x128xf32>
    %66 = math.exp %65 : vector<32x128xf32>
    %cst_31 = arith.constant 1.000000e+00 : f32
    %67 = vector.broadcast %cst_31 : f32 to vector<32x128xf32>
    %68 = arith.addf %67, %66 : vector<32x128xf32>
    %69 = arith.divf %67, %68 : vector<32x128xf32>
    %70 = arith.mulf %64, %69 : vector<32x128xf32>
    %71 = vector.extract_strided_slice %63 {offsets = [0, 128], sizes = [32, 128], strides = [1, 1]} : vector<32x256xf32> to vector<32x128xf32>
    %72 = arith.mulf %70, %71 : vector<32x128xf32>
    %cst_32 = arith.constant dense<0.000000e+00> : vector<32x128xf32>
    %73 = tpu.matmul %72, %9, %cst_32 {dimension_numbers = #tpu.dot_dimension_numbers<[1], [0], [0], [1], [0, 0, 1, 1], [], []>} : vector<32x128xf32>, vector<128x128xf32>, vector<32x128xf32> -> vector<32x128xf32>
    %74 = arith.addf %49, %73 : vector<32x128xf32>
    %c0_33 = arith.constant 0 : index
    %c0_34 = arith.constant 0 : index
    %75 = vector.load %arg8[%c0_33, %c0_34] : memref<32x128xf32, #tpu.memory_space<vmem>>, vector<32x128xf32>
    tpu.vector_store %arg8[%c0_33, %c0_34], %74 {strides = array<i32>} : memref<32x128xf32, #tpu.memory_space<vmem>>, vector<32x128xf32>,
    return
  }
}

</mosaic_0001>

<bundles_post_ra>
// kernel: tpu_custom_call.1
= control target key start
LH: loop header
LB: loop body
LE: loop exit
PB: predicated region body
PF: predicated region fallthrough
CT: control target
= control target key end

     0   :  { %13 = vsyncpa [#allocation3], 0  ;;  %s4708_s0 = inlined_call_operand.hbm [shape: f32[32,128], index: 0, kind: input, shape index: {}]   ;;  %s4709_s1 = inlined_call_operand.hbm [shape: f32[32,32], index: 1, kind: input, shape index: {}]   ;;  %s4710_s2 = inlined_call_operand.hbm [shape: bf16[12,32,128], index: 2, kind: input, shape index: {}]   ;;  %s4711_s3 = inlined_call_operand.hbm [shape: bf16[4,32,128], index: 3, kind: input, shape index: {}]   ;;  %s4712_s4 = inlined_call_operand.hbm [shape: bf16[128,256], index: 4, kind: input, shape index: {}]   ;;  %s4713_s5 = inlined_call_operand.hbm [shape: bf16[128,128], index: 5, kind: input, shape index: {}]   ;;  %s4714_s6 = inlined_call_operand.vmem [shape: f32[1,128], index: 6, kind: input, shape index: {}]   ;;  %s4715_s7 = inlined_call_operand.vmem [shape: f32[1,128], index: 7, kind: input, shape index: {}]   ;;  %s4716_s8 = inlined_call_operand.hbm [shape: f32[32,128], index: 8, kind: output, shape index: {}]  }
   0x1   :  { %14 = vsyncpa [#allocation6], 0 }
   0x2   :  { %15 = vsyncpa [#allocation9], 0 }
   0x3   :  { %16 = vsyncpa [#allocation12], 0 }
   0x4   :  { %17 = vsyncpa [#allocation4], 0  ;;  %s4213_s27 = smov [#allocation5]  }
   0x5   :  { %s35_s28 = sshll.u32 %s4213_s27, 4  ;;  %s36_s28 = int_to_ptr.vmem [resolvable:$true] %s35_s28 }
   0x6   :  { %s4071_s29 = scalar_lea.vmem %s36_s28, 512  ;;  %p4076_p1 = scmp.lt.s32.totalorder %s36_s28, %s36_s28 }
   0x7   :  { %p4072_p0 = scmp.ne.s32.totalorder %s36_s28, %s4071_s29  ;;  %p4077_p2 = scmp.lt.s32.totalorder %s4071_s29, %s4071_s29 }
   0x9   :  { %p4078_p3 = por %p4077_p2, %p4076_p1 }
   0xb   :  { %p4079_p4 = pnand %p4078_p3, %p4072_p0 }
   0xd   :  { %4082 = shalt.err (!%p4079_p4)
}
   0xe   :  { %s4214_s30 = smov 128   ;;  %s4215_s9 = smov 8  }
   0xf   :  { %41 = dma.hbm_to_vmem [thread:$0]  %s4709_s1, 512, %s36_s28, [#allocation6], %s4214_s30, %s4214_s30, %s4215_s9  }
  0x10   :  { %s4216_s12 = smov [#allocation8]   ;;  %s4217_s14 = smov [#allocation2]  }
  0x11   :  { %s59_s13 = sshll.u32 %s4216_s12, 4  ;;  %s23_s15 = sshll.u32 %s4217_s14, 4  ;;  %s60_s13 = int_to_ptr.vmem [resolvable:$true] %s59_s13  ;;  %s24_s15 = int_to_ptr.vmem [resolvable:$true] %s23_s15 }
  0x12   :  { %s4091_s16 = scalar_lea.vmem %s60_s13, 1024  ;;  %p4096_p6 = scmp.lt.s32.totalorder %s60_s13, %s60_s13 }
  0x13   :  { %p4092_p5 = scmp.ne.s32.totalorder %s60_s13, %s4091_s16  ;;  %p4097_p7 = scmp.lt.s32.totalorder %s4091_s16, %s4091_s16 }
  0x15   :  { %p4098_p8 = por %p4097_p7, %p4096_p6 }
  0x17   :  { %p4099_p9 = pnand %p4098_p8, %p4092_p5 }
  0x19   :  { %4102 = shalt.err (!%p4099_p9)
}
  0x1a   :  { %s4218_s17 = smov 64   ;;  %s4219_s18 = smov 4  }
  0x1b   :  { %65 = dma.hbm_to_vmem [thread:$0]  %s4711_s3, 1024, %s60_s13, [#allocation9], %s4218_s17, %s4218_s17, %s4219_s18  }
  0x1c   :  { %s4111_s1 = scalar_lea.vmem %s24_s15, 512  ;;  %p4116_p11 = scmp.lt.s32.totalorder %s24_s15, %s24_s15 }
  0x1d   :  { %p4112_p10 = scmp.ne.s32.totalorder %s24_s15, %s4111_s1  ;;  %p4117_p12 = scmp.lt.s32.totalorder %s4111_s1, %s4111_s1 }
  0x1f   :  { %p4118_p13 = por %p4117_p12, %p4116_p11 }
  0x21   :  { %p4119_p0 = pnand %p4118_p13, %p4112_p10 }
  0x23   :  { %4122 = shalt.err (!%p4119_p0)
}
  0x24   :  { %29 = dma.hbm_to_vmem [thread:$0]  %s4708_s0, 512, %s24_s15, [#allocation3], %s4214_s30, %s4214_s30, %s4215_s9  }
  0x25   :  { %s4220_s23 = smov [#allocation7]   ;;  %s4221_s25 = smov [#allocation10]  }
  0x26   :  { %s47_s24 = sshll.u32 %s4220_s23, 4  ;;  %s71_s3 = sshll.u32 %s4221_s25, 4  ;;  %s48_s24 = int_to_ptr.vmem [resolvable:$true] %s47_s24  ;;  %s72_s3 = int_to_ptr.vmem [resolvable:$true] %s71_s3 }
  0x27   :  { %s4131_s26 = scalar_lea.vmem %s48_s24, 3072  ;;  %p4136_p2 = scmp.lt.s32.totalorder %s48_s24, %s48_s24 }
  0x28   :  { %p4132_p1 = scmp.ne.s32.totalorder %s48_s24, %s4131_s26  ;;  %p4137_p3 = scmp.lt.s32.totalorder %s4131_s26, %s4131_s26 }
  0x2a   :  { %p4138_p4 = por %p4137_p3, %p4136_p2 }
  0x2c   :  { %p4139_p5 = pnand %p4138_p4, %p4132_p1 }
  0x2e   :  { %4142 = shalt.err (!%p4139_p5)
}
  0x2f   :  { %53 = dma.hbm_to_vmem [thread:$0]  %s4710_s2, 3072, %s48_s24, [#allocation6], %s4218_s17, %s4218_s17, %s4219_s18  }
  0x30   :  { %s4151_s0 = scalar_lea.vmem %s72_s3, 2048  ;;  %p4156_p7 = scmp.lt.s32.totalorder %s72_s3, %s72_s3 }
  0x31   :  { %p4152_p6 = scmp.ne.s32.totalorder %s72_s3, %s4151_s0  ;;  %p4157_p8 = scmp.lt.s32.totalorder %s4151_s0, %s4151_s0 }
  0x33   :  { %p4158_p9 = por %p4157_p8, %p4156_p7 }
  0x35   :  { %p4159_p10 = pnand %p4158_p9, %p4152_p6 }
  0x37   :  { %4162 = shalt.err (!%p4159_p10)
}
  0x38   :  { %77 = dma.hbm_to_vmem [thread:$0]  %s4712_s4, 2048, %s72_s3, [#allocation9], %s4214_s30, %s4214_s30, %s4215_s9  }
  0x39   :  { %s4222_s11 = smov [#allocation11]  }
  0x3a   :  { %s83_s12 = sshll.u32 %s4222_s11, 4  ;;  %s84_s12 = int_to_ptr.vmem [resolvable:$true] %s83_s12 }
  0x3b   :  { %s4171_s13 = scalar_lea.vmem %s84_s12, 1024  ;;  %p4176_p12 = scmp.lt.s32.totalorder %s84_s12, %s84_s12 }
  0x3c   :  { %p4172_p11 = scmp.ne.s32.totalorder %s84_s12, %s4171_s13  ;;  %p4177_p13 = scmp.lt.s32.totalorder %s4171_s13, %s4171_s13 }
  0x3e   :  { %p4178_p0 = por %p4177_p13, %p4176_p12 }
  0x40   :  { %p4179_p1 = pnand %p4178_p0, %p4172_p11 }
  0x42   :  { %4182 = shalt.err (!%p4179_p1)
}
  0x43   :  { %89 = dma.hbm_to_vmem [thread:$0]  %s4713_s5, 1024, %s84_s12, [#allocation12], %s4218_s17, %s4218_s17, %s4219_s18  }
  0x44   :  { %4203 = dma.done.wait [#allocation3], 512  }
  0x45   :  { %4204 = vsyncadd [#allocation3], 4294966784 }
  0x46   :  { %4205 = dma.done.wait [#allocation6], 3584  }
  0x47   :  { %4206 = vsyncadd [#allocation6], 4294963712 }
  0x48   :  { %4207 = dma.done.wait [#allocation9], 3072  }
  0x49   :  { %4208 = vsyncadd [#allocation9], 4294964224 }
  0x4a   :  { %4209 = dma.done.wait [#allocation12], 1024  }
  0x4b   :  { %4210 = vsyncadd [#allocation12], 4294966272  ;;  %v4306_v0 = vld [vmem:[#allocation2] sm:$0xff]  ;;  %v4308_v1 = vld [vmem:[#allocation2 + $0x10] sm:$0xff]  ;;  %vm1388_vm0 = vcmask 261120  }
  0x4c   :  { %v4310_v2 = vld [vmem:[#allocation2 + $0x8] sm:$0xff]  ;;  %v329_v3 = vmul.f32 %v4306_v0, %v4306_v0  ;;  %v331_v4 = vmul.f32 %v4308_v1, %v4308_v1  ;;  %v4316_v5 = vld [vmem:[#allocation2 + $0x18] sm:$0xff]  ;;  %v3169_v14 = vld [vmem:[#allocation7] sm:$0xff]  }
  0x4d   :  { %v330_v6 = vmul.f32 %v4310_v2, %v4310_v2  ;;  %v332_v7 = vmul.f32 %v4316_v5, %v4316_v5  ;;  %v3328_v8 = vld [vmem:[#allocation7 + $0x8] sm:$0xff]   ;;  %v3330_v9 = vld [vmem:[#allocation7 + $0x18] sm:$0xff]   ;;  %v3329_v15 = vld [vmem:[#allocation7 + $0x10] sm:$0xff]   ;;  %v3171_v16 = vunpack.c.h.bf16 %v3169_v14  ;;  %v3170_v18 = vunpack.c.l.bf16 %v3169_v14 }
  0x4e   :  { %333 = vadd.xlane.f32.xlu0 %v329_v3  ;;  %337 = vadd.xlane.f32.xlu1 %v331_v4  ;;  %v3175_v10 = vunpack.c.h.bf16 %v3328_v8  ;;  %v3183_v11 = vunpack.c.h.bf16 %v3330_v9  ;;  %v3174_v12 = vunpack.c.l.bf16 %v3328_v8  ;;  %v3182_v13 = vunpack.c.l.bf16 %v3330_v9  ;;  %v3332_v20 = vld [vmem:[#allocation7 + $0x28] sm:$0xff]   ;;  %v3334_v21 = vld [vmem:[#allocation7 + $0x38] sm:$0xff]   ;;  %v3098_v37 = vld [vmem:[%s4714_s6] ss:$0 sm:$0xff] }
  0x4f   :  { %v3179_v17 = vunpack.c.h.bf16 %v3329_v15  ;;  %v3178_v19 = vunpack.c.l.bf16 %v3329_v15  ;;  %v3191_v22 = vunpack.c.h.bf16 %v3332_v20  ;;  %v3199_v23 = vunpack.c.h.bf16 %v3334_v21  ;;  %v3331_v51 = vld [vmem:[#allocation7 + $0x20] sm:$0xff]   ;;  %v3333_v52 = vld [vmem:[#allocation7 + $0x30] sm:$0xff]   ;;  %v3336_v57 = vld [vmem:[#allocation7 + $0x48] sm:$0xff]  }
  0x50   :  { %3577 = vmatprep.subr.mxu0 %v3175_v10  ;;  %3591 = vmatprep.subr.mxu1 %v3183_v11  ;;  %v3190_v48 = vunpack.c.l.bf16 %v3332_v20  ;;  %v3198_v49 = vunpack.c.l.bf16 %v3334_v21  ;;  %v3187_v53 = vunpack.c.h.bf16 %v3331_v51  ;;  %v3195_v54 = vunpack.c.h.bf16 %v3333_v52  ;;  %v3338_v58 = vld [vmem:[#allocation7 + $0x58] sm:$0xff]   ;;  %v3335_v63 = vld [vmem:[#allocation7 + $0x40] sm:$0xff]  }
  0x51   :  { %3578 = vmatpush3.xpose.msra.mxu0 %v3175_v10  ;;  %3592 = vmatpush3.xpose.msra.mxu1 %v3183_v11  ;;  %v3186_v55 = vunpack.c.l.bf16 %v3331_v51  ;;  %v3194_v56 = vunpack.c.l.bf16 %v3333_v52  ;;  %v3207_v59 = vunpack.c.h.bf16 %v3336_v57  ;;  %v3215_v60 = vunpack.c.h.bf16 %v3338_v58  ;;  %v3339_v11 = vld [vmem:[#allocation7 + $0x60] sm:$0xff]  }
  0x52   :  { %335 = vadd.xlane.f32.xlu0 %v330_v6  ;;  %339 = vadd.xlane.f32.xlu1 %v332_v7  ;;  %v3206_v61 = vunpack.c.l.bf16 %v3336_v57  ;;  %v3214_v62 = vunpack.c.l.bf16 %v3338_v58  ;;  %v3202_v3 = vunpack.c.l.bf16 %v3335_v63  ;;  %v3342_v6 = vld [vmem:[#allocation7 + $0x78] sm:$0xff]   ;;  %v3218_v15 = vunpack.c.l.bf16 %v3339_v11 }
  0x53   :  { %3579 = vmatprep.subr.mxu0 %v3174_v12  ;;  %3593 = vmatprep.subr.mxu1 %v3182_v13  ;;  %v3231_v8 = vunpack.c.h.bf16 %v3342_v6  ;;  %v3230_v10 = vunpack.c.l.bf16 %v3342_v6 }
  0x55   :  { %3580 = vmatpush3.xpose.msra.mxu0 %v3174_v12  ;;  %3594 = vmatpush3.xpose.msra.mxu1 %v3182_v13  ;;  %v3341_v12 = vld [vmem:[#allocation7 + $0x70] sm:$0xff]   ;;  %v3219_v13 = vunpack.c.h.bf16 %v3339_v11 }
  0x56   :  { %3581 = vmatprep.subr.mxu0 %v3171_v16  ;;  %3595 = vmatprep.subr.mxu1 %v3179_v17  ;;  %v3227_v14 = vunpack.c.h.bf16 %v3341_v12 }
  0x59   :  { %3582 = vmatpush3.xpose.msra.mxu0 %v3171_v16  ;;  %3596 = vmatpush3.xpose.msra.mxu1 %v3179_v17  ;;  %v3226_v16 = vunpack.c.l.bf16 %v3341_v12  ;;  %v3344_v17 = vld [vmem:[#allocation7 + $0x88] sm:$0xff]  }
  0x5a   :  { %3583 = vmatprep.subr.mxu0 %v3170_v18  ;;  %3597 = vmatprep.subr.mxu1 %v3178_v19  ;;  %v3238_v21 = vunpack.c.l.bf16 %v3344_v17 }
  0x5d   :  { %3584 = vmatpush3.xpose.msra.mxu0 %v3170_v18  ;;  %3598 = vmatpush3.xpose.msra.mxu1 %v3178_v19  ;;  %v3346_v18 = vld [vmem:[#allocation7 + $0x98] sm:$0xff]   ;;  %v3239_v19 = vunpack.c.h.bf16 %v3344_v17 }
  0x5e   :  { %3605 = vmatprep.subr.mxu0 %v3191_v22  ;;  %3619 = vmatprep.subr.mxu1 %v3199_v23  ;;  %v3247_v20 = vunpack.c.h.bf16 %v3346_v18 }
  0xd7   :  { %v334_v24 = vpop.xlane.xlu0 %333  ;;  %v338_v25 = vpop.xlane.xlu1 %337 }
  0xd8   :  { %v342_v26 = vmul.f32 0.0078125, %v334_v24  ;;  %v344_v27 = vmul.f32 0.0078125, %v338_v25  ;;  %v3345_v24 = vld [vmem:[#allocation7 + $0x90] sm:$0xff]  }
  0xda   :  { %v346_v28 = vadd.f32 1e-05, %v342_v26  ;;  %v348_v29 = vadd.f32 1e-05, %v344_v27  ;;  %v3243_v26 = vunpack.c.h.bf16 %v3345_v24 }
  0xdb   :  { %v336_v30 = vpop.xlane.xlu0 %335  ;;  %v340_v31 = vpop.xlane.xlu1 %339 }
  0xdc   :  { %3963 = vrsqrt.f32 %v346_v28  ;;  %v343_v32 = vmul.f32 0.0078125, %v336_v30  ;;  %v345_v33 = vmul.f32 0.0078125, %v340_v31  ;;  %v3242_v28 = vunpack.c.l.bf16 %v3345_v24  ;;  %v3350_v30 = vld [vmem:[#allocation7 + $0xb8] sm:$0xff]  }
  0xdd   :  { %3965 = vrsqrt.f32 %v348_v29  ;;  %v3348_v29 = vld [vmem:[#allocation7 + $0xa8] sm:$0xff]  }
  0xde   :  { %v347_v34 = vadd.f32 1e-05, %v343_v32  ;;  %v349_v35 = vadd.f32 1e-05, %v345_v33  ;;  %v3255_v31 = vunpack.c.h.bf16 %v3348_v29  ;;  %v3263_v32 = vunpack.c.h.bf16 %v3350_v30 }
  0xdf   :  { %v3254_v33 = vunpack.c.l.bf16 %v3348_v29 }
  0xe0   :  { %3967 = vrsqrt.f32 %v347_v34  ;;  %v3262_v34 = vunpack.c.l.bf16 %v3350_v30 }
  0xe1   :  { %3969 = vrsqrt.f32 %v349_v35  ;;  %v3347_v35 = vld [vmem:[#allocation7 + $0xa0] sm:$0xff]  }
  0xe9   :  { %v3964_v36 = vpop.eup %3963 }
  0xea   :  { %v3966_v38 = vpop.eup %3965  ;;  %v354_v39 = vmul.f32 %v3964_v36, %v4306_v0  ;;  %v3337_v0 = vld [vmem:[#allocation7 + $0x50] sm:$0xff]  }
  0xeb   :  { %v356_v41 = vmul.f32 %v3966_v38, %v4308_v1  ;;  %v3203_v1 = vunpack.c.h.bf16 %v3335_v63  ;;  %v3210_v4 = vunpack.c.l.bf16 %v3337_v0  ;;  %v3349_v36 = vld [vmem:[#allocation7 + $0xb0] sm:$0xff]  }
  0xec   :  { %v4326_v40 = vmul.f32 %v3098_v37, %v354_v39  ;;  %v3259_v38 = vunpack.c.h.bf16 %v3349_v36  ;;  %v3250_v39 = vunpack.c.l.bf16 %v3347_v35 }
  0xed   :  { %v3968_v42 = vpop.eup %3967  ;;  %v4333_v46 = vmul.f32 %v3098_v37, %v356_v41  ;;  %v3258_v41 = vunpack.c.l.bf16 %v3349_v36 }
  0xee   :  { %v3970_v43 = vpop.eup %3969  ;;  %v355_v44 = vmul.f32 %v3968_v42, %v4310_v2  ;;  %3585 = vmatprep.mubr.f32.mxu0 %v4326_v40  ;;  %3599 = vmatprep.mubr.f32.mxu1 %v4326_v40  ;;  %v3211_v2 = vunpack.c.h.bf16 %v3337_v0 }
  0xef   :  { %v357_v45 = vmul.f32 %v3970_v43, %v4316_v5  ;;  %v3340_v5 = vld [vmem:[#allocation7 + $0x68] sm:$0xff]  }
  0xf0   :  { %v4335_v47 = vmul.f32 %v3098_v37, %v355_v44  ;;  %v3223_v7 = vunpack.c.h.bf16 %v3340_v5  ;;  %v3222_v9 = vunpack.c.l.bf16 %v3340_v5 }
  0xf1   :  { %v4337_v50 = vmul.f32 %v3098_v37, %v357_v45  ;;  %v3251_v37 = vunpack.c.h.bf16 %v3347_v35 }
  0xf2   :  { %3586 = vmatmul.mubr.f32.vlgmr.msra.gmra.mxu0 %v4335_v47  ;;  %3600 = vmatmul.mubr.f32.vlgmr.msra.gmra.mxu1 %v4335_v47 }
  0xf3   :  { %3606 = vmatpush3.xpose.msra.mxu0 %v3191_v22  ;;  %3620 = vmatpush3.xpose.msra.mxu1 %v3199_v23  ;;  %v3246_v22 = vunpack.c.l.bf16 %v3346_v18  ;;  %v3343_v23 = vld [vmem:[#allocation7 + $0x80] sm:$0xff]  }
  0xf4   :  { %3588 = vmatprep.mubr.f32.mxu0 %v4333_v46  ;;  %3602 = vmatprep.mubr.f32.mxu1 %v4333_v46  ;;  %v3235_v25 = vunpack.c.h.bf16 %v3343_v23  ;;  %v3234_v27 = vunpack.c.l.bf16 %v3343_v23 }
  0xf5   :  { %3607 = vmatprep.subr.mxu0 %v3190_v48  ;;  %3621 = vmatprep.subr.mxu1 %v3198_v49 }
  0xf6   :  { %3589 = vmatmul.mubr.f32.gmra.mxu0 %v4337_v50  ;;  %3603 = vmatmul.mubr.f32.gmra.mxu1 %v4337_v50 }
  0xf7   :  { %3608 = vmatpush3.xpose.msra.mxu0 %v3190_v48  ;;  %3622 = vmatpush3.xpose.msra.mxu1 %v3198_v49 }
  0xf8   :  { %3613 = vmatprep.mubr.f32.mxu0 %v4326_v40  ;;  %3627 = vmatprep.mubr.f32.mxu1 %v4326_v40 }
  0xf9   :  { %3609 = vmatprep.subr.mxu0 %v3187_v53  ;;  %3623 = vmatprep.subr.mxu1 %v3195_v54 }
  0xfb   :  { %3610 = vmatpush3.xpose.msra.mxu0 %v3187_v53  ;;  %3624 = vmatpush3.xpose.msra.mxu1 %v3195_v54 }
  0xfc   :  { %3611 = vmatprep.subr.mxu0 %v3186_v55  ;;  %3625 = vmatprep.subr.mxu1 %v3194_v56 }
  0xff   :  { %3612 = vmatpush3.xpose.msra.mxu0 %v3186_v55  ;;  %3626 = vmatpush3.xpose.msra.mxu1 %v3194_v56 }
 0x100   :  { %3633 = vmatprep.subr.mxu0 %v3207_v59  ;;  %3647 = vmatprep.subr.mxu1 %v3215_v60 }
 0x102   :  { %3614 = vmatmul.mubr.f32.vlgmr.msra.gmra.mxu0 %v4335_v47  ;;  %3628 = vmatmul.mubr.f32.vlgmr.msra.gmra.mxu1 %v4335_v47 }
 0x103   :  { %3616 = vmatprep.mubr.f32.mxu0 %v4333_v46  ;;  %3630 = vmatprep.mubr.f32.mxu1 %v4333_v46 }
 0x104   :  { %3634 = vmatpush3.xpose.msra.mxu0 %v3207_v59  ;;  %3648 = vmatpush3.xpose.msra.mxu1 %v3215_v60 }
 0x105   :  { %3635 = vmatprep.subr.mxu0 %v3206_v61  ;;  %3649 = vmatprep.subr.mxu1 %v3214_v62 }
 0x106   :  { %3617 = vmatmul.mubr.f32.gmra.mxu0 %v4337_v50  ;;  %3631 = vmatmul.mubr.f32.gmra.mxu1 %v4337_v50 }
 0x107   :  { %3641 = vmatprep.mubr.f32.mxu0 %v4326_v40  ;;  %3655 = vmatprep.mubr.f32.mxu1 %v4326_v40 }
 0x108   :  { %3636 = vmatpush3.xpose.msra.mxu0 %v3206_v61  ;;  %3650 = vmatpush3.xpose.msra.mxu1 %v3214_v62 }
 0x109   :  { %3637 = vmatprep.subr.mxu0 %v3203_v1  ;;  %3651 = vmatprep.subr.mxu1 %v3211_v2 }
 0x10c   :  { %3638 = vmatpush3.xpose.msra.mxu0 %v3203_v1  ;;  %3652 = vmatpush3.xpose.msra.mxu1 %v3211_v2 }
 0x10d   :  { %3639 = vmatprep.subr.mxu0 %v3202_v3  ;;  %3653 = vmatprep.subr.mxu1 %v3210_v4 }
 0x110   :  { %3640 = vmatpush3.xpose.msra.mxu0 %v3202_v3  ;;  %3654 = vmatpush3.xpose.msra.mxu1 %v3210_v4 }
 0x111   :  { %3661 = vmatprep.subr.mxu0 %v3223_v7  ;;  %3675 = vmatprep.subr.mxu1 %v3231_v8 }
 0x113   :  { %3642 = vmatmul.mubr.f32.vlgmr.msra.gmra.mxu0 %v4335_v47  ;;  %3656 = vmatmul.mubr.f32.vlgmr.msra.gmra.mxu1 %v4335_v47 }
 0x114   :  { %3644 = vmatprep.mubr.f32.mxu0 %v4333_v46  ;;  %3658 = vmatprep.mubr.f32.mxu1 %v4333_v46 }
 0x115   :  { %3662 = vmatpush3.xpose.msra.mxu0 %v3223_v7  ;;  %3676 = vmatpush3.xpose.msra.mxu1 %v3231_v8 }
 0x116   :  { %3663 = vmatprep.subr.mxu0 %v3222_v9  ;;  %3677 = vmatprep.subr.mxu1 %v3230_v10 }
 0x117   :  { %3645 = vmatmul.mubr.f32.gmra.mxu0 %v4337_v50  ;;  %3659 = vmatmul.mubr.f32.gmra.mxu1 %v4337_v50 }
 0x118   :  { %3669 = vmatprep.mubr.f32.mxu0 %v4326_v40  ;;  %3683 = vmatprep.mubr.f32.mxu1 %v4326_v40 }
 0x119   :  { %3664 = vmatpush3.xpose.msra.mxu0 %v3222_v9  ;;  %3678 = vmatpush3.xpose.msra.mxu1 %v3230_v10 }
 0x11a   :  { %3665 = vmatprep.subr.mxu0 %v3219_v13  ;;  %3679 = vmatprep.subr.mxu1 %v3227_v14 }
 0x11d   :  { %3666 = vmatpush3.xpose.msra.mxu0 %v3219_v13  ;;  %3680 = vmatpush3.xpose.msra.mxu1 %v3227_v14 }
 0x11e   :  { %3667 = vmatprep.subr.mxu0 %v3218_v15  ;;  %3681 = vmatprep.subr.mxu1 %v3226_v16 }
 0x121   :  { %3668 = vmatpush3.xpose.msra.mxu0 %v3218_v15  ;;  %3682 = vmatpush3.xpose.msra.mxu1 %v3226_v16 }
 0x122   :  { %3689 = vmatprep.subr.mxu0 %v3239_v19  ;;  %3703 = vmatprep.subr.mxu1 %v3247_v20 }
 0x124   :  { %3670 = vmatmul.mubr.f32.vlgmr.msra.gmra.mxu0 %v4335_v47  ;;  %3684 = vmatmul.mubr.f32.vlgmr.msra.gmra.mxu1 %v4335_v47 }
 0x125   :  { %3672 = vmatprep.mubr.f32.mxu0 %v4333_v46  ;;  %3686 = vmatprep.mubr.f32.mxu1 %v4333_v46 }
 0x126   :  { %3690 = vmatpush3.xpose.msra.mxu0 %v3239_v19  ;;  %3704 = vmatpush3.xpose.msra.mxu1 %v3247_v20 }
 0x127   :  { %3691 = vmatprep.subr.mxu0 %v3238_v21  ;;  %3705 = vmatprep.subr.mxu1 %v3246_v22 }
 0x128   :  { %3673 = vmatmul.mubr.f32.gmra.mxu0 %v4337_v50  ;;  %3687 = vmatmul.mubr.f32.gmra.mxu1 %v4337_v50 }
 0x129   :  { %3697 = vmatprep.mubr.f32.mxu0 %v4326_v40  ;;  %3711 = vmatprep.mubr.f32.mxu1 %v4326_v40 }
 0x12a   :  { %3692 = vmatpush3.xpose.msra.mxu0 %v3238_v21  ;;  %3706 = vmatpush3.xpose.msra.mxu1 %v3246_v22 }
 0x12b   :  { %3693 = vmatprep.subr.mxu0 %v3235_v25  ;;  %3707 = vmatprep.subr.mxu1 %v3243_v26 }
 0x12e   :  { %3694 = vmatpush3.xpose.msra.mxu0 %v3235_v25  ;;  %3708 = vmatpush3.xpose.msra.mxu1 %v3243_v26 }
 0x12f   :  { %3695 = vmatprep.subr.mxu0 %v3234_v27  ;;  %3709 = vmatprep.subr.mxu1 %v3242_v28 }
 0x132   :  { %3696 = vmatpush3.xpose.msra.mxu0 %v3234_v27  ;;  %3710 = vmatpush3.xpose.msra.mxu1 %v3242_v28  ;;  %v117_v27 = vld [vmem:[#allocation5 + $0x8] sm:$0xff] }
 0x133   :  { %3717 = vmatprep.subr.mxu0 %v3255_v31  ;;  %3731 = vmatprep.subr.mxu1 %v3263_v32 }
 0x135   :  { %3698 = vmatmul.mubr.f32.vlgmr.msra.gmra.mxu0 %v4335_v47  ;;  %3712 = vmatmul.mubr.f32.vlgmr.msra.gmra.mxu1 %v4335_v47 }
 0x136   :  { %3700 = vmatprep.mubr.f32.mxu0 %v4333_v46  ;;  %3714 = vmatprep.mubr.f32.mxu1 %v4333_v46 }
 0x137   :  { %3718 = vmatpush3.xpose.msra.mxu0 %v3255_v31  ;;  %3732 = vmatpush3.xpose.msra.mxu1 %v3263_v32  ;;  %v116_v32 = vld [vmem:[#allocation5] sm:$0xff] }
 0x138   :  { %3719 = vmatprep.subr.mxu0 %v3254_v33  ;;  %3733 = vmatprep.subr.mxu1 %v3262_v34 }
 0x139   :  { %3701 = vmatmul.mubr.f32.gmra.mxu0 %v4337_v50  ;;  %3715 = vmatmul.mubr.f32.gmra.mxu1 %v4337_v50 }
 0x13a   :  { %3725 = vmatprep.mubr.f32.mxu0 %v4326_v40  ;;  %3739 = vmatprep.mubr.f32.mxu1 %v4326_v40 }
 0x13b   :  { %3720 = vmatpush3.xpose.msra.mxu0 %v3254_v33  ;;  %3734 = vmatpush3.xpose.msra.mxu1 %v3262_v34 }
 0x13c   :  { %3721 = vmatprep.subr.mxu0 %v3251_v37  ;;  %3735 = vmatprep.subr.mxu1 %v3259_v38 }
 0x13f   :  { %3722 = vmatpush3.xpose.msra.mxu0 %v3251_v37  ;;  %3736 = vmatpush3.xpose.msra.mxu1 %v3259_v38 }
 0x140   :  { %3723 = vmatprep.subr.mxu0 %v3250_v39  ;;  %3737 = vmatprep.subr.mxu1 %v3258_v41 }
 0x143   :  { %3724 = vmatpush3.xpose.msra.mxu0 %v3250_v39  ;;  %3738 = vmatpush3.xpose.msra.mxu1 %v3258_v41 }
 0x146   :  { %3726 = vmatmul.mubr.f32.vlgmr.msra.gmra.mxu0 %v4335_v47  ;;  %3740 = vmatmul.mubr.f32.vlgmr.msra.gmra.mxu1 %v4335_v47 }
 0x147   :  { %3728 = vmatprep.mubr.f32.mxu0 %v4333_v46  ;;  %3742 = vmatprep.mubr.f32.mxu1 %v4333_v46 }
 0x14a   :  { %3729 = vmatmul.mubr.f32.gmra.mxu0 %v4337_v50  ;;  %3743 = vmatmul.mubr.f32.gmra.mxu1 %v4337_v50 }
 0x1b2   :  { %v3587_v40 = vpop.f32.mrf.mxu0  ;;  %v3601_v42 = vpop.f32.mrf.mxu1 }
 0x1b4   :  { %v434_v43 = vpop.f32.mrf.mxu0  ;;  %v519_v44 = vpop.f32.mrf.mxu1 }
 0x1b5   :  { %3753 = vmatprep.mubr.msk.f32.mxu0 %vm1388_vm0, %v434_v43  ;;  %3767 = vmatprep.mubr.msk.f32.mxu1 %vm1388_vm0, %v519_v44 }
 0x1b6   :  { %v3590_v45 = vpop.f32.mrf.mxu0  ;;  %v3604_v48 = vpop.f32.mrf.mxu1 }
 0x1b8   :  { %v444_v47 = vpop.f32.mrf.mxu0  ;;  %v529_v49 = vpop.f32.mrf.mxu1 }
 0x1c2   :  { %v4387_v51 = vpop.f32.mrf.mxu0  ;;  %v4389_v46 = vpop.f32.mrf.mxu1 }
 0x1c4   :  { %v604_v52 = vpop.f32.mrf.mxu0  ;;  %v689_v53 = vpop.f32.mrf.mxu1 }
 0x1c6   :  { %v4391_v50 = vpop.f32.mrf.mxu0  ;;  %v4393_v54 = vpop.f32.mrf.mxu1 }
 0x1c8   :  { %v4395_v55 = vpop.f32.mrf.mxu0  ;;  %v4397_v56 = vpop.f32.mrf.mxu1 }
 0x1d3   :  { %v3643_v57 = vpop.f32.mrf.mxu0  ;;  %v3657_v58 = vpop.f32.mrf.mxu1 }
 0x1d5   :  { %v774_v59 = vpop.f32.mrf.mxu0  ;;  %v859_v60 = vpop.f32.mrf.mxu1 }
 0x1d7   :  { %v3646_v61 = vpop.f32.mrf.mxu0  ;;  %v3660_v62 = vpop.f32.mrf.mxu1 }
 0x1d8   :  { %3745 = vmatprep.subr.msk.mxu0 %vm1388_vm0, %v3646_v61  ;;  %3759 = vmatprep.subr.msk.mxu1 %vm1388_vm0, %v3660_v62 }
 0x1d9   :  { %v784_v63 = vpop.f32.mrf.mxu0  ;;  %v869_v0 = vpop.f32.mrf.mxu1  ;;  %3746 = vmatpush3.xpose.msk.msra.mxu0 %vm1388_vm0, %v3646_v61  ;;  %3760 = vmatpush3.xpose.msk.msra.mxu1 %vm1388_vm0, %v3660_v62 }
 0x1da   :  { %3747 = vmatprep.subr.msk.mxu0 %vm1388_vm0, %v784_v63  ;;  %3761 = vmatprep.subr.msk.mxu1 %vm1388_vm0, %v869_v0 }
 0x1dd   :  { %3748 = vmatpush3.xpose.msk.msra.mxu0 %vm1388_vm0, %v784_v63  ;;  %3762 = vmatpush3.xpose.msk.msra.mxu1 %vm1388_vm0, %v869_v0 }
 0x1de   :  { %3749 = vmatprep.subr.msk.mxu0 %vm1388_vm0, %v3643_v57  ;;  %3763 = vmatprep.subr.msk.mxu1 %vm1388_vm0, %v3657_v58 }
 0x1e1   :  { %3750 = vmatpush3.xpose.msk.msra.mxu0 %vm1388_vm0, %v3643_v57  ;;  %3764 = vmatpush3.xpose.msk.msra.mxu1 %vm1388_vm0, %v3657_v58 }
 0x1e2   :  { %3751 = vmatprep.subr.msk.mxu0 %vm1388_vm0, %v774_v59  ;;  %3765 = vmatprep.subr.msk.mxu1 %vm1388_vm0, %v859_v60 }
 0x1e4   :  { %v3671_v1 = vpop.f32.mrf.mxu0  ;;  %v3685_v2 = vpop.f32.mrf.mxu1 }
 0x1e5   :  { %3752 = vmatpush3.xpose.msk.msra.mxu0 %vm1388_vm0, %v774_v59  ;;  %3766 = vmatpush3.xpose.msk.msra.mxu1 %vm1388_vm0, %v859_v60 }
 0x1e6   :  { %v944_v3 = vpop.f32.mrf.mxu0  ;;  %v1029_v4 = vpop.f32.mrf.mxu1 }
 0x1e8   :  { %v3674_v5 = vpop.f32.mrf.mxu0  ;;  %v3688_v6 = vpop.f32.mrf.mxu1  ;;  %3754 = vmatmul.mubr.msk.f32.vlgmr.msra.gmra.mxu0 %vm1388_vm0, %v3587_v40  ;;  %3768 = vmatmul.mubr.msk.f32.vlgmr.msra.gmra.mxu1 %vm1388_vm0, %v3601_v42  ;;  %v119_v42 = vld [vmem:[#allocation5 + $0x18] sm:$0xff] }
 0x1e9   :  { %3773 = vmatprep.subr.msk.mxu0 %vm1388_vm0, %v3674_v5  ;;  %3787 = vmatprep.subr.msk.mxu1 %vm1388_vm0, %v3688_v6 }
 0x1ea   :  { %v954_v7 = vpop.f32.mrf.mxu0  ;;  %v1039_v8 = vpop.f32.mrf.mxu1  ;;  %3756 = vmatprep.mubr.msk.f32.mxu0 %vm1388_vm0, %v444_v47  ;;  %3770 = vmatprep.mubr.msk.f32.mxu1 %vm1388_vm0, %v529_v49  ;;  %v118_v49 = vld [vmem:[#allocation5 + $0x10] sm:$0xff] }
 0x1eb   :  { %3774 = vmatpush3.xpose.msk.msra.mxu0 %vm1388_vm0, %v3674_v5  ;;  %3788 = vmatpush3.xpose.msk.msra.mxu1 %vm1388_vm0, %v3688_v6 }
 0x1ec   :  { %3775 = vmatprep.subr.msk.mxu0 %vm1388_vm0, %v954_v7  ;;  %3789 = vmatprep.subr.msk.mxu1 %vm1388_vm0, %v1039_v8 }
 0x1ed   :  { %3757 = vmatmul.mubr.msk.f32.gmra.mxu0 %vm1388_vm0, %v3590_v45  ;;  %3771 = vmatmul.mubr.msk.f32.gmra.mxu1 %vm1388_vm0, %v3604_v48 }
 0x1ee   :  { %3781 = vmatprep.mubr.msk.f32.mxu0 %vm1388_vm0, %v604_v52  ;;  %3795 = vmatprep.mubr.msk.f32.mxu1 %vm1388_vm0, %v689_v53 }
 0x1ef   :  { %3776 = vmatpush3.xpose.msk.msra.mxu0 %vm1388_vm0, %v954_v7  ;;  %3790 = vmatpush3.xpose.msk.msra.mxu1 %vm1388_vm0, %v1039_v8 }
 0x1f0   :  { %3777 = vmatprep.subr.msk.mxu0 %vm1388_vm0, %v3671_v1  ;;  %3791 = vmatprep.subr.msk.mxu1 %vm1388_vm0, %v3685_v2 }
 0x1f3   :  { %3778 = vmatpush3.xpose.msk.msra.mxu0 %vm1388_vm0, %v3671_v1  ;;  %3792 = vmatpush3.xpose.msk.msra.mxu1 %vm1388_vm0, %v3685_v2 }
 0x1f4   :  { %3779 = vmatprep.subr.msk.mxu0 %vm1388_vm0, %v944_v3  ;;  %3793 = vmatprep.subr.msk.mxu1 %vm1388_vm0, %v1029_v4 }
 0x1f5   :  { %v3699_v9 = vpop.f32.mrf.mxu0  ;;  %v3713_v10 = vpop.f32.mrf.mxu1 }
 0x1f7   :  { %v1114_v11 = vpop.f32.mrf.mxu0  ;;  %v1199_v12 = vpop.f32.mrf.mxu1  ;;  %3780 = vmatpush3.xpose.msk.msra.mxu0 %vm1388_vm0, %v944_v3  ;;  %3794 = vmatpush3.xpose.msk.msra.mxu1 %vm1388_vm0, %v1029_v4 }
 0x1f9   :  { %v3702_v13 = vpop.f32.mrf.mxu0  ;;  %v3716_v14 = vpop.f32.mrf.mxu1 }
 0x1fa   :  { %3782 = vmatmul.mubr.msk.f32.vlgmr.msra.gmra.mxu0 %vm1388_vm0, %v4387_v51  ;;  %3796 = vmatmul.mubr.msk.f32.vlgmr.msra.gmra.mxu1 %vm1388_vm0, %v4389_v46 }
 0x1fb   :  { %3801 = vmatprep.subr.mxu0 %v3702_v13  ;;  %3815 = vmatprep.subr.mxu1 %v3716_v14  ;;  %v1124_v15 = vpop.f32.mrf.mxu0  ;;  %v1209_v16 = vpop.f32.mrf.mxu1 }
 0x1fc   :  { %3784 = vmatprep.mubr.msk.f32.mxu0 %vm1388_vm0, %v4395_v55  ;;  %3798 = vmatprep.mubr.msk.f32.mxu1 %vm1388_vm0, %v4397_v56 }
 0x1fd   :  { %3802 = vmatpush3.msra.mxu0 %v3702_v13  ;;  %3816 = vmatpush3.msra.mxu1 %v3716_v14 }
 0x1fe   :  { %3803 = vmatprep.subr.mxu0 %v1124_v15  ;;  %3817 = vmatprep.subr.mxu1 %v1209_v16 }
 0x1ff   :  { %3804 = vmatpush3.msra.mxu0 %v1124_v15  ;;  %3818 = vmatpush3.msra.mxu1 %v1209_v16 }
 0x200   :  { %3785 = vmatmul.mubr.msk.f32.gmra.mxu0 %vm1388_vm0, %v4391_v50  ;;  %3799 = vmatmul.mubr.msk.f32.gmra.mxu1 %vm1388_vm0, %v4393_v54 }
 0x201   :  { %3805 = vmatprep.subr.mxu0 %v3699_v9  ;;  %3819 = vmatprep.subr.mxu1 %v3713_v10 }
 0x202   :  { %3806 = vmatpush3.msra.mxu0 %v3699_v9  ;;  %3820 = vmatpush3.msra.mxu1 %v3713_v10 }
 0x203   :  { %3807 = vmatprep.subr.mxu0 %v1114_v11  ;;  %3821 = vmatprep.subr.mxu1 %v1199_v12 }
 0x204   :  { %3808 = vmatpush3.msra.mxu0 %v1114_v11  ;;  %3822 = vmatpush3.msra.mxu1 %v1199_v12 }
 0x206   :  { %v4451_v17 = vpop.f32.mrf.mxu0  ;;  %v4453_v18 = vpop.f32.mrf.mxu1 }
 0x208   :  { %v4455_v19 = vpop.f32.mrf.mxu0  ;;  %v4457_v20 = vpop.f32.mrf.mxu1 }
 0x20a   :  { %v4459_v21 = vpop.f32.mrf.mxu0  ;;  %v4461_v22 = vpop.f32.mrf.mxu1 }
 0x20b   :  { %3829 = vmatprep.subr.mxu0 %v4459_v21  ;;  %3843 = vmatprep.subr.mxu1 %v4461_v22 }
 0x20c   :  { %v4465_v23 = vpop.f32.mrf.mxu0  ;;  %v4467_v24 = vpop.f32.mrf.mxu1 }
 0x2a8   :  { %v3755_v25 = vpop.f32.mrf.mxu0  ;;  %v3769_v26 = vpop.f32.mrf.mxu1 }
 0x2a9   :  { %v1826_v28 = vmul.f32 0.17677669, %v3755_v25  ;;  %v1830_v29 = vmul.f32 0.17677669, %v3769_v26 }
 0x2aa   :  { %v1479_v30 = vpop.f32.mrf.mxu0  ;;  %v1588_v31 = vpop.f32.mrf.mxu1 }
 0x2ab   :  { %v1825_v33 = vmul.f32 0.17677669, %v1479_v30  ;;  %v1829_v34 = vmul.f32 0.17677669, %v1588_v31  ;;  %v4469_v35 = vadd.f32 %v1826_v28, %v117_v27  ;;  %v4475_v41 = vadd.f32 %v1830_v29, %v117_v27 }
 0x2ad   :  { %v3758_v36 = vpop.f32.mrf.mxu0  ;;  %v3772_v37 = vpop.f32.mrf.mxu1  ;;  %v1860_v38 = vsel %vm1388_vm0, %v4469_v35, -inf  ;;  %v4473_v39 = vadd.f32 %v1825_v33, %v116_v32  ;;  %v4479_v45 = vadd.f32 %v1829_v34, %v116_v32  ;;  %v1872_v46 = vsel %vm1388_vm0, %v4475_v41, -inf }
 0x2ae   :  { %v1828_v40 = vmul.f32 0.17677669, %v3758_v36  ;;  %1861 = vmax.xlane.f32.xlu1 %v1860_v38  ;;  %v1832_v51 = vmul.f32 0.17677669, %v3772_v37 }
 0x2af   :  { %v1489_v43 = vpop.f32.mrf.mxu0  ;;  %v1857_v44 = vsel %vm1388_vm0, %v4473_v39, -inf  ;;  %v1598_v48 = vpop.f32.mrf.mxu1  ;;  %v1869_v50 = vsel %vm1388_vm0, %v4479_v45, -inf }
 0x2b0   :  { %v1827_v47 = vmul.f32 0.17677669, %v1489_v43  ;;  %1858 = vmax.xlane.f32.xlu0 %v1857_v44  ;;  %v4483_v52 = vadd.f32 %v1828_v40, %v119_v42  ;;  %v1831_v53 = vmul.f32 0.17677669, %v1598_v48  ;;  %v4491_v56 = vadd.f32 %v1832_v51, %v119_v42 }
 0x2b2   :  { %1873 = vmax.xlane.f32.xlu1 %v1872_v46  ;;  %v4487_v54 = vadd.f32 %v1827_v47, %v118_v49  ;;  %v1866_v55 = vsel %vm1388_vm0, %v4483_v52, -inf  ;;  %v4495_v58 = vadd.f32 %v1831_v53, %v118_v49  ;;  %v1878_v59 = vsel %vm1388_vm0, %v4491_v56, -inf }
 0x2b4   :  { %1870 = vmax.xlane.f32.xlu0 %v1869_v50  ;;  %v1863_v57 = vsel %vm1388_vm0, %v4487_v54, -inf  ;;  %v1875_v0 = vsel %vm1388_vm0, %v4495_v58, -inf }
 0x2b6   :  { %1867 = vmax.xlane.f32.xlu1 %v1866_v55 }
 0x2b8   :  { %1864 = vmax.xlane.f32.xlu0 %v1863_v57 }
 0x2ba   :  { %v3797_v60 = vpop.f32.mrf.mxu1  ;;  %v3783_v61 = vpop.f32.mrf.mxu0  ;;  %1879 = vmax.xlane.f32.xlu1 %v1878_v59 }
 0x2bb   :  { %v1838_v62 = vmul.f32 0.17677669, %v3797_v60  ;;  %v1834_v63 = vmul.f32 0.17677669, %v3783_v61 }
 0x2bc   :  { %v1806_v1 = vpop.f32.mrf.mxu1  ;;  %v1697_v2 = vpop.f32.mrf.mxu0  ;;  %1876 = vmax.xlane.f32.xlu0 %v1875_v0 }
 0x2bd   :  { %v1837_v3 = vmul.f32 0.17677669, %v1806_v1  ;;  %v1833_v4 = vmul.f32 0.17677669, %v1697_v2  ;;  %v4501_v5 = vadd.f32 %v1834_v63, %v117_v27  ;;  %v4507_v8 = vadd.f32 %v1838_v62, %v117_v27 }
 0x2bf   :  { %v1884_v6 = vsel %vm1388_vm0, %v4501_v5, -inf  ;;  %v4505_v7 = vadd.f32 %v1833_v4, %v116_v32  ;;  %v4511_v13 = vadd.f32 %v1837_v3, %v116_v32  ;;  %v1896_v26 = vsel %vm1388_vm0, %v4507_v8, -inf }
 0x2c0   :  { %v3800_v9 = vpop.f32.mrf.mxu1  ;;  %v3786_v10 = vpop.f32.mrf.mxu0  ;;  %1885 = vmax.xlane.f32.xlu1 %v1884_v6 }
 0x2c1   :  { %v1836_v11 = vmul.f32 0.17677669, %v3786_v10  ;;  %v1881_v12 = vsel %vm1388_vm0, %v4505_v7, -inf  ;;  %v1840_v16 = vmul.f32 0.17677669, %v3800_v9  ;;  %v1893_v29 = vsel %vm1388_vm0, %v4511_v13, -inf }
 0x2c2   :  { %v1816_v14 = vpop.f32.mrf.mxu1  ;;  %v1707_v15 = vpop.f32.mrf.mxu0  ;;  %1882 = vmax.xlane.f32.xlu0 %v1881_v12 }
 0x2c3   :  { %v1835_v25 = vmul.f32 0.17677669, %v1707_v15  ;;  %v4515_v28 = vadd.f32 %v1836_v11, %v119_v42  ;;  %v1839_v27 = vmul.f32 0.17677669, %v1816_v14  ;;  %v4523_v32 = vadd.f32 %v1840_v16, %v119_v42 }
 0x2c4   :  { %1897 = vmax.xlane.f32.xlu1 %v1896_v26 }
 0x2c5   :  { %v4519_v30 = vadd.f32 %v1835_v25, %v118_v49  ;;  %v1890_v31 = vsel %vm1388_vm0, %v4515_v28, -inf  ;;  %v4527_v34 = vadd.f32 %v1839_v27, %v118_v49  ;;  %v1902_v36 = vsel %vm1388_vm0, %v4523_v32, -inf }
 0x2c6   :  { %1894 = vmax.xlane.f32.xlu0 %v1893_v29 }
 0x2c7   :  { %v1887_v33 = vsel %vm1388_vm0, %v4519_v30, -inf  ;;  %v1899_v37 = vsel %vm1388_vm0, %v4527_v34, -inf }
 0x2c8   :  { %1891 = vmax.xlane.f32.xlu1 %v1890_v31 }
 0x2ca   :  { %1888 = vmax.xlane.f32.xlu0 %v1887_v33 }
 0x2cc   :  { %1903 = vmax.xlane.f32.xlu1 %v1902_v36 }
 0x2ce   :  { %1900 = vmax.xlane.f32.xlu0 %v1899_v37 }
 0x337   :  { %v1862_v38 = vpop.xlane.xlu1 %1861 }
 0x338   :  { %v1906_v40 = vsub.f32 %v4469_v35, %v1862_v38 }
 0x339   :  { %v1859_v42 = vpop.xlane.xlu0 %1858 }
 0x33a   :  { %v1923_v43 = vmul.f32 1.442695, %v1906_v40  ;;  %v1905_v44 = vsub.f32 %v4473_v39, %v1859_v42 }
 0x33b   :  { %v1874_v48 = vpop.xlane.xlu1 %1873 }
 0x33c   :  { %3971 = vpow2.f32 %v1923_v43  ;;  %v1921_v47 = vmul.f32 1.442695, %v1905_v44  ;;  %v1910_v49 = vsub.f32 %v4475_v41, %v1874_v48 }
 0x33d   :  { %v1871_v51 = vpop.xlane.xlu0 %1870 }
 0x33e   :  { %3973 = vpow2.f32 %v1921_v47  ;;  %v1931_v46 = vmul.f32 1.442695, %v1910_v49  ;;  %v1909_v53 = vsub.f32 %v4479_v45, %v1871_v51 }
 0x33f   :  { %v1868_v50 = vpop.xlane.xlu1 %1867 }
 0x340   :  { %3975 = vpow2.f32 %v1931_v46  ;;  %v1929_v55 = vmul.f32 1.442695, %v1909_v53  ;;  %v1908_v57 = vsub.f32 %v4483_v52, %v1868_v50 }
 0x341   :  { %v1865_v35 = vpop.xlane.xlu0 %1864 }
 0x342   :  { %3977 = vpow2.f32 %v1929_v55  ;;  %v1927_v59 = vmul.f32 1.442695, %v1908_v57  ;;  %v1907_v39 = vsub.f32 %v4487_v54, %v1865_v35 }
 0x343   :  { %v1880_v60 = vpop.xlane.xlu1 %1879 }
 0x344   :  { %3979 = vpow2.f32 %v1927_v59  ;;  %v1925_v61 = vmul.f32 1.442695, %v1907_v39  ;;  %v1912_v41 = vsub.f32 %v4491_v56, %v1880_v60 }
 0x345   :  { %v1877_v62 = vpop.xlane.xlu0 %1876 }
 0x346   :  { %3981 = vpow2.f32 %v1925_v61  ;;  %v1935_v63 = vmul.f32 1.442695, %v1912_v41  ;;  %v1911_v45 = vsub.f32 %v4495_v58, %v1877_v62 }
 0x348   :  { %3983 = vpow2.f32 %v1935_v63  ;;  %v1933_v0 = vmul.f32 1.442695, %v1911_v45 }
 0x349   :  { %v4541_v1 = vpop.eup %3971  ;;  %v1886_v52 = vpop.xlane.xlu1 %1885 }
 0x34a   :  { %3985 = vpow2.f32 %v1933_v0  ;;  %v1914_v2 = vsub.f32 %v4501_v5, %v1886_v52  ;;  %v1956_v54 = vsel %vm1388_vm0, %v4541_v1, 0.0 }
 0x34b   :  { %v4546_v3 = vpop.eup %3973  ;;  %v1883_v4 = vpop.xlane.xlu0 %1882  ;;  %1957 = vadd.xlane.f32.xlu1 %v1956_v54 }
 0x34c   :  { %v1939_v56 = vmul.f32 1.442695, %v1914_v2  ;;  %v1913_v6 = vsub.f32 %v4505_v7, %v1883_v4  ;;  %v1953_v58 = vsel %vm1388_vm0, %v4546_v3, 0.0 }
 0x34d   :  { %v4551_v9 = vpop.eup %3975  ;;  %v1898_v10 = vpop.xlane.xlu1 %1897  ;;  %1954 = vadd.xlane.f32.xlu0 %v1953_v58 }
 0x34e   :  { %3987 = vpow2.f32 %v1939_v56  ;;  %v1937_v11 = vmul.f32 1.442695, %v1913_v6  ;;  %v1918_v5 = vsub.f32 %v4507_v8, %v1898_v10  ;;  %v1968_v12 = vsel %vm1388_vm0, %v4551_v9, 0.0 }
 0x34f   :  { %v4556_v14 = vpop.eup %3977  ;;  %v1895_v15 = vpop.xlane.xlu0 %1894  ;;  %1969 = vadd.xlane.f32.xlu1 %v1968_v12 }
 0x350   :  { %3989 = vpow2.f32 %v1937_v11  ;;  %v1947_v7 = vmul.f32 1.442695, %v1918_v5  ;;  %v1917_v16 = vsub.f32 %v4511_v13, %v1895_v15  ;;  %v1965_v25 = vsel %vm1388_vm0, %v4556_v14, 0.0 }
 0x351   :  { %v4561_v26 = vpop.eup %3979  ;;  %v1892_v27 = vpop.xlane.xlu1 %1891  ;;  %1966 = vadd.xlane.f32.xlu0 %v1965_v25 }
 0x352   :  { %3991 = vpow2.f32 %v1947_v7  ;;  %v1945_v8 = vmul.f32 1.442695, %v1917_v16  ;;  %v1916_v29 = vsub.f32 %v4515_v28, %v1892_v27  ;;  %v1962_v31 = vsel %vm1388_vm0, %v4561_v26, 0.0 }
 0x353   :  { %v4566_v33 = vpop.eup %3981  ;;  %v1889_v36 = vpop.xlane.xlu0 %1888  ;;  %1963 = vadd.xlane.f32.xlu1 %v1962_v31 }
 0x354   :  { %3993 = vpow2.f32 %v1945_v8  ;;  %v1943_v13 = vmul.f32 1.442695, %v1916_v29  ;;  %v1915_v37 = vsub.f32 %v4519_v30, %v1889_v36  ;;  %v1959_v38 = vsel %vm1388_vm0, %v4566_v33, 0.0 }
 0x355   :  { %v4571_v40 = vpop.eup %3983  ;;  %v1904_v42 = vpop.xlane.xlu1 %1903  ;;  %1960 = vadd.xlane.f32.xlu0 %v1959_v38 }
 0x356   :  { %3995 = vpow2.f32 %v1943_v13  ;;  %v1941_v28 = vmul.f32 1.442695, %v1915_v37  ;;  %v1920_v43 = vsub.f32 %v4523_v32, %v1904_v42  ;;  %v1974_v44 = vsel %vm1388_vm0, %v4571_v40, 0.0 }
 0x357   :  { %v4576_v48 = vpop.eup %3985  ;;  %v1901_v47 = vpop.xlane.xlu0 %1900  ;;  %1975 = vadd.xlane.f32.xlu1 %v1974_v44 }
 0x358   :  { %3997 = vpow2.f32 %v1941_v28  ;;  %v1951_v30 = vmul.f32 1.442695, %v1920_v43  ;;  %v1919_v49 = vsub.f32 %v4527_v34, %v1901_v47  ;;  %v1971_v51 = vsel %vm1388_vm0, %v4576_v48, 0.0 }
 0x359   :  { %1972 = vadd.xlane.f32.xlu0 %v1971_v51 }
 0x35a   :  { %3999 = vpow2.f32 %v1951_v30  ;;  %v1949_v46 = vmul.f32 1.442695, %v1919_v49 }
 0x35b   :  { %v4581_v53 = vpop.eup %3987 }
 0x35c   :  { %4001 = vpow2.f32 %v1949_v46  ;;  %v1980_v32 = vsel %vm1388_vm0, %v4581_v53, 0.0 }
 0x35d   :  { %v4585_v50 = vpop.eup %3989  ;;  %1981 = vadd.xlane.f32.xlu1 %v1980_v32 }
 0x35e   :  { %v1977_v55 = vsel %vm1388_vm0, %v4585_v50, 0.0 }
 0x35f   :  { %v4589_v57 = vpop.eup %3991  ;;  %1978 = vadd.xlane.f32.xlu0 %v1977_v55  ;;  %v3265_v55 = vld [vmem:[#allocation8] sm:$0xff]  }
 0x360   :  { %v1992_v34 = vsel %vm1388_vm0, %v4589_v57, 0.0 }
 0x361   :  { %v4593_v35 = vpop.eup %3993  ;;  %1993 = vadd.xlane.f32.xlu1 %v1992_v34  ;;  %v3267_v34 = vunpack.c.h.bf16 %v3265_v55 }
 0x362   :  { %v1989_v59 = vsel %vm1388_vm0, %v4593_v35, 0.0 }
 0x363   :  { %v4597_v39 = vpop.eup %3995  ;;  %1990 = vadd.xlane.f32.xlu0 %v1989_v59  ;;  %v3266_v59 = vunpack.c.l.bf16 %v3265_v55 }
 0x364   :  { %v1986_v60 = vsel %vm1388_vm0, %v4597_v39, 0.0 }
 0x365   :  { %v4601_v61 = vpop.eup %3997  ;;  %1987 = vadd.xlane.f32.xlu1 %v1986_v60  ;;  %v3352_v60 = vld [vmem:[#allocation8 + $0x10] sm:$0xff]  }
 0x366   :  { %v1983_v41 = vsel %vm1388_vm0, %v4601_v61, 0.0 }
 0x367   :  { %v4605_v62 = vpop.eup %3999  ;;  %1984 = vadd.xlane.f32.xlu0 %v1983_v41  ;;  %v3274_v41 = vunpack.c.l.bf16 %v3352_v60 }
 0x368   :  { %v1998_v63 = vsel %vm1388_vm0, %v4605_v62, 0.0 }
 0x369   :  { %v4609_v45 = vpop.eup %4001  ;;  %1999 = vadd.xlane.f32.xlu1 %v1998_v63 }
 0x36a   :  { %v1995_v0 = vsel %vm1388_vm0, %v4609_v45, 0.0 }
 0x36b   :  { %1996 = vadd.xlane.f32.xlu0 %v1995_v0 }
 0x3d4   :  { %v1958_v52 = vpop.xlane.xlu1 %1957 }
 0x3d5   :  { %4003 = vrcp.f32 %v1958_v52 }
 0x3d6   :  { %v1955_v2 = vpop.xlane.xlu0 %1954 }
 0x3d7   :  { %4005 = vrcp.f32 %v1955_v2  ;;  %v3354_v2 = vld [vmem:[#allocation8 + $0x20] sm:$0xff]  }
 0x3d8   :  { %v1970_v54 = vpop.xlane.xlu1 %1969 }
 0x3d9   :  { %4007 = vrcp.f32 %v1970_v54 }
 0x3da   :  { %v1967_v4 = vpop.xlane.xlu0 %1966 }
 0x3db   :  { %4009 = vrcp.f32 %v1967_v4 }
 0x3dc   :  { %v1964_v56 = vpop.xlane.xlu1 %1963 }
 0x3dd   :  { %4011 = vrcp.f32 %v1964_v56 }
 0x3de   :  { %v1961_v6 = vpop.xlane.xlu0 %1960 }
 0x3df   :  { %4013 = vrcp.f32 %v1961_v6  ;;  %v3283_v6 = vunpack.c.h.bf16 %v3354_v2 }
 0x3e0   :  { %v1976_v58 = vpop.xlane.xlu1 %1975 }
 0x3e1   :  { %4015 = vrcp.f32 %v1976_v58  ;;  %v3356_v58 = vld [vmem:[#allocation8 + $0x30] sm:$0xff]  }
 0x3e2   :  { %v1973_v10 = vpop.xlane.xlu0 %1972  ;;  %v4004_v11 = vpop.eup %4003 }
 0x3e3   :  { %4017 = vrcp.f32 %v1973_v10  ;;  %v2018_v15 = vmul.f32 %v4004_v11, %v4541_v1 }
 0x3e4   :  { %v4006_v5 = vpop.eup %4005 }
 0x3e5   :  { %v2017_v12 = vmul.f32 %v4006_v5, %v4546_v3  ;;  %v3351_v3 = vld [vmem:[#allocation8 + $0x8] sm:$0xff]   ;;  %v3282_v5 = vunpack.c.l.bf16 %v3354_v2 }
 0x3e6   :  { %v1982_v7 = vpop.xlane.xlu1 %1981  ;;  %v4008_v16 = vpop.eup %4007  ;;  %v3270_v43 = vunpack.c.l.bf16 %v3351_v3 }
 0x3e7   :  { %3809 = vmatprep.mubr.msk.f32.mxu0 %vm1388_vm0, %v2017_v12  ;;  %4019 = vrcp.f32 %v1982_v7  ;;  %v2022_v29 = vmul.f32 %v4008_v16, %v4551_v9  ;;  %v3291_v12 = vunpack.c.h.bf16 %v3356_v58  ;;  %v3290_v7 = vunpack.c.l.bf16 %v3356_v58 }
 0x3e8   :  { %v4010_v25 = vpop.eup %4009  ;;  %v1979_v27 = vpop.xlane.xlu0 %1978  ;;  %3810 = vmatmul.mubr.msk.f32.vlgmr.msra.gmra.mxu0 %vm1388_vm0, %v2018_v15 }
 0x3e9   :  { %4021 = vrcp.f32 %v1979_v27  ;;  %3830 = vmatpush3.msra.mxu0 %v4459_v21  ;;  %v2021_v8 = vmul.f32 %v4010_v25, %v4556_v14 }
 0x3ea   :  { %v1994_v31 = vpop.xlane.xlu1 %1993  ;;  %3831 = vmatprep.subr.mxu0 %v4465_v23  ;;  %v4012_v1 = vpop.eup %4011 }
 0x3eb   :  { %3832 = vmatpush3.msra.mxu0 %v4465_v23  ;;  %3823 = vmatprep.mubr.msk.f32.mxu1 %vm1388_vm0, %v2021_v8  ;;  %4023 = vrcp.f32 %v1994_v31  ;;  %v3271_v23 = vunpack.c.h.bf16 %v3351_v3  ;;  %v2020_v37 = vmul.f32 %v4012_v1, %v4561_v26 }
 0x3ec   :  { %v4014_v36 = vpop.eup %4013  ;;  %v1991_v13 = vpop.xlane.xlu0 %1990  ;;  %3833 = vmatprep.subr.mxu0 %v4451_v17  ;;  %3824 = vmatmul.mubr.msk.f32.vlgmr.msra.gmra.mxu1 %vm1388_vm0, %v2022_v29 }
 0x3ed   :  { %4025 = vrcp.f32 %v1991_v13  ;;  %3834 = vmatpush3.msra.mxu0 %v4451_v17  ;;  %3844 = vmatpush3.msra.mxu1 %v4461_v22  ;;  %v2019_v21 = vmul.f32 %v4014_v36, %v4566_v33 }
 0x3ee   :  { %v1988_v9 = vpop.xlane.xlu1 %1987  ;;  %3835 = vmatprep.subr.mxu0 %v4455_v19  ;;  %3845 = vmatprep.subr.mxu1 %v4467_v24  ;;  %v4016_v14 = vpop.eup %4015 }
 0x3ef   :  { %3836 = vmatpush3.msra.mxu0 %v4455_v19  ;;  %3846 = vmatpush3.msra.mxu1 %v4467_v24  ;;  %4027 = vrcp.f32 %v1988_v9  ;;  %v2024_v19 = vmul.f32 %v4016_v14, %v4571_v40  ;;  %v263_v9 = vld [vmem:[#allocation10 + $0x78] sm:$0xff]  ;;  %v261_v14 = vld [vmem:[#allocation10 + $0x68] sm:$0xff] }
 0x3f0   :  { %v4018_v38 = vpop.eup %4017  ;;  %v1985_v17 = vpop.xlane.xlu0 %1984  ;;  %3812 = vmatprep.mubr.msk.f32.mxu0 %vm1388_vm0, %v2019_v21  ;;  %3847 = vmatprep.subr.mxu1 %v4453_v18 }
 0x3f1   :  { %4029 = vrcp.f32 %v1985_v17  ;;  %3813 = vmatmul.mubr.msk.f32.gmra.mxu0 %vm1388_vm0, %v2020_v37  ;;  %3848 = vmatpush3.msra.mxu1 %v4453_v18  ;;  %v2023_v22 = vmul.f32 %v4018_v38, %v4576_v48  ;;  %v294_v37 = vunpack.c.l.bf16 %v263_v9  ;;  %v295_v38 = vunpack.c.h.bf16 %v263_v9  ;;  %v255_v9 = vld [vmem:[#allocation10 + $0x38] sm:$0xff] }
 0x3f2   :  { %v2000_v33 = vpop.xlane.xlu1 %1999  ;;  %3849 = vmatprep.subr.mxu1 %v4457_v20  ;;  %3857 = vmatprep.subr.mxu0 %v3271_v23 }
 0x3f3   :  { %3850 = vmatpush3.msra.mxu1 %v4457_v20  ;;  %3826 = vmatprep.mubr.msk.f32.mxu1 %vm1388_vm0, %v2023_v22  ;;  %4031 = vrcp.f32 %v2000_v33  ;;  %v260_v33 = vld [vmem:[#allocation10 + $0x60] sm:$0xff] }
 0x3f4   :  { %v1997_v24 = vpop.xlane.xlu0 %1996  ;;  %3827 = vmatmul.mubr.msk.f32.gmra.mxu1 %vm1388_vm0, %v2024_v19  ;;  %v4020_v26 = vpop.eup %4019  ;;  %v291_v19 = vunpack.c.h.bf16 %v261_v14 }
 0x3f5   :  { %4033 = vrcp.f32 %v1997_v24  ;;  %v2026_v28 = vmul.f32 %v4020_v26, %v4581_v53  ;;  %v290_v24 = vunpack.c.l.bf16 %v261_v14  ;;  %v289_v26 = vunpack.c.h.bf16 %v260_v33 }
 0x3f6   :  { %v4022_v42 = vpop.eup %4021  ;;  %v278_v14 = vunpack.c.l.bf16 %v255_v9 }
 0x3f7   :  { %v2025_v18 = vmul.f32 %v4022_v42, %v4585_v50  ;;  %v288_v42 = vunpack.c.l.bf16 %v260_v33 }
 0x3f8   :  { %v4024_v44 = vpop.eup %4023 }
 0x3f9   :  { %3837 = vmatprep.mubr.msk.f32.mxu0 %vm1388_vm0, %v2025_v18  ;;  %v2030_v48 = vmul.f32 %v4024_v44, %v4589_v57  ;;  %v3353_v57 = vld [vmem:[#allocation8 + $0x18] sm:$0xff]  }
 0x3fa   :  { %v4026_v40 = vpop.eup %4025  ;;  %3838 = vmatmul.mubr.msk.f32.vlgmr.msra.gmra.mxu0 %vm1388_vm0, %v2026_v28 }
 0x3fb   :  { %v2029_v20 = vmul.f32 %v4026_v40, %v4593_v35  ;;  %3858 = vmatpush3.msra.mxu0 %v3271_v23  ;;  %v3279_v35 = vunpack.c.h.bf16 %v3353_v57  ;;  %v262_v23 = vld [vmem:[#allocation10 + $0x70] sm:$0xff] }
 0x3fc   :  { %3859 = vmatprep.subr.mxu0 %v3270_v43  ;;  %v4028_v47 = vpop.eup %4027  ;;  %v293_v17 = vunpack.c.h.bf16 %v262_v23  ;;  %v292_v22 = vunpack.c.l.bf16 %v262_v23  ;;  %v279_v23 = vunpack.c.h.bf16 %v255_v9 }
 0x3fd   :  { %3851 = vmatprep.mubr.msk.f32.mxu1 %vm1388_vm0, %v2029_v20  ;;  %3860 = vmatpush3.msra.mxu0 %v3270_v43  ;;  %v2028_v51 = vmul.f32 %v4028_v47, %v4597_v39  ;;  %v3278_v39 = vunpack.c.l.bf16 %v3353_v57 }
 0x3fe   :  { %v4030_v30 = vpop.eup %4029  ;;  %3852 = vmatmul.mubr.msk.f32.vlgmr.msra.gmra.mxu1 %vm1388_vm0, %v2030_v48  ;;  %3861 = vmatprep.subr.mxu0 %v3267_v34 }
 0x3ff   :  { %v2027_v49 = vmul.f32 %v4030_v30, %v4601_v61  ;;  %3871 = vmatprep.subr.mxu1 %v3279_v35  ;;  %3862 = vmatpush3.msra.mxu0 %v3267_v34  ;;  %v3275_v61 = vunpack.c.h.bf16 %v3352_v60  ;;  %v4059_v34 = vld [vmem:[#allocation2 + $0x8] sm:$0xff] }
 0x400   :  { %v4032_v46 = vpop.eup %4031  ;;  %3872 = vmatpush3.msra.mxu1 %v3279_v35  ;;  %3863 = vmatprep.subr.mxu0 %v3266_v59 }
 0x401   :  { %3840 = vmatprep.mubr.msk.f32.mxu0 %vm1388_vm0, %v2027_v49  ;;  %v2032_v50 = vmul.f32 %v4032_v46, %v4605_v62  ;;  %3873 = vmatprep.subr.mxu1 %v3278_v39  ;;  %v3355_v62 = vld [vmem:[#allocation8 + $0x28] sm:$0xff]  }
 0x402   :  { %v4034_v53 = vpop.eup %4033  ;;  %3841 = vmatmul.mubr.msk.f32.gmra.mxu0 %vm1388_vm0, %v2028_v51  ;;  %3874 = vmatpush3.msra.mxu1 %v3278_v39  ;;  %v3287_v63 = vunpack.c.h.bf16 %v3355_v62  ;;  %v3286_v4 = vunpack.c.l.bf16 %v3355_v62 }
 0x403   :  { %v2031_v32 = vmul.f32 %v4034_v53, %v4609_v45  ;;  %3864 = vmatpush3.msra.mxu0 %v3266_v59  ;;  %3875 = vmatprep.subr.mxu1 %v3275_v61  ;;  %v3357_v45 = vld [vmem:[#allocation8 + $0x38] sm:$0xff]  }
 0x404   :  { %3876 = vmatpush3.msra.mxu1 %v3275_v61  ;;  %3885 = vmatprep.subr.mxu0 %v3287_v63  ;;  %v3295_v0 = vunpack.c.h.bf16 %v3357_v45  ;;  %v3294_v11 = vunpack.c.l.bf16 %v3357_v45  ;;  %v4060_v61 = vld [vmem:[#allocation2] sm:$0xff] }
 0x405   :  { %3854 = vmatprep.mubr.msk.f32.mxu1 %vm1388_vm0, %v2031_v32  ;;  %3877 = vmatprep.subr.mxu1 %v3274_v41 }
 0x406   :  { %3855 = vmatmul.mubr.msk.f32.gmra.mxu1 %vm1388_vm0, %v2032_v50 }
 0x407   :  { %3878 = vmatpush3.msra.mxu1 %v3274_v41 }
 0x408   :  { %3899 = vmatprep.subr.mxu1 %v3295_v0 }
 0x4a8   :  { %v3811_v52 = vpop.f32.mrf.mxu0 }
 0x4aa   :  { %v2111_v54 = vpop.f32.mrf.mxu0 }
 0x4ab   :  { %3865 = vmatprep.mubr.msk.f32.mxu0 %vm1388_vm0, %v2111_v54 }
 0x4ac   :  { %v3825_v56 = vpop.f32.mrf.mxu1  ;;  %3866 = vmatmul.mubr.msk.f32.vlgmr.msra.gmra.mxu0 %vm1388_vm0, %v3811_v52 }
 0x4ad   :  { %3886 = vmatpush3.msra.mxu0 %v3287_v63 }
 0x4ae   :  { %v2208_v10 = vpop.f32.mrf.mxu1  ;;  %3887 = vmatprep.subr.mxu0 %v3286_v4 }
 0x4af   :  { %3879 = vmatprep.mubr.msk.f32.mxu1 %vm1388_vm0, %v2208_v10  ;;  %3888 = vmatpush3.msra.mxu0 %v3286_v4 }
 0x4b0   :  { %3880 = vmatmul.mubr.msk.f32.vlgmr.msra.gmra.mxu1 %vm1388_vm0, %v3825_v56  ;;  %3889 = vmatprep.subr.mxu0 %v3283_v6 }
 0x4b1   :  { %v3814_v15 = vpop.f32.mrf.mxu0  ;;  %3900 = vmatpush3.msra.mxu1 %v3295_v0  ;;  %3890 = vmatpush3.msra.mxu0 %v3283_v6  ;;  %v4061_v6 = vld [vmem:[#allocation2 + $0x18] sm:$0xff] }
 0x4b2   :  { %3901 = vmatprep.subr.mxu1 %v3294_v11  ;;  %3891 = vmatprep.subr.mxu0 %v3282_v5 }
 0x4b3   :  { %v2121_v16 = vpop.f32.mrf.mxu0  ;;  %3902 = vmatpush3.msra.mxu1 %v3294_v11  ;;  %3892 = vmatpush3.msra.mxu0 %v3282_v5  ;;  %v4062_v11 = vld [vmem:[#allocation2 + $0x10] sm:$0xff] }
 0x4b4   :  { %3868 = vmatprep.mubr.msk.f32.mxu0 %vm1388_vm0, %v2121_v16  ;;  %v3828_v25 = vpop.f32.mrf.mxu1  ;;  %3903 = vmatprep.subr.mxu1 %v3291_v12 }
 0x4b5   :  { %3869 = vmatmul.mubr.msk.f32.gmra.mxu0 %vm1388_vm0, %v3814_v15  ;;  %3904 = vmatpush3.msra.mxu1 %v3291_v12 }
 0x4b6   :  { %v2218_v27 = vpop.f32.mrf.mxu1  ;;  %3905 = vmatprep.subr.mxu1 %v3290_v7  ;;  %2864 = vmatprep.subr.mxu0 %v295_v38 }
 0x4b7   :  { %3882 = vmatprep.mubr.msk.f32.mxu1 %vm1388_vm0, %v2218_v27  ;;  %3906 = vmatpush3.msra.mxu1 %v3290_v7  ;;  %v259_v7 = vld [vmem:[#allocation10 + $0x58] sm:$0xff]  ;;  %v258_v27 = vld [vmem:[#allocation10 + $0x50] sm:$0xff] }
 0x4b8   :  { %3883 = vmatmul.mubr.msk.f32.gmra.mxu1 %vm1388_vm0, %v3828_v25  ;;  %v287_v16 = vunpack.c.h.bf16 %v259_v7  ;;  %v286_v25 = vunpack.c.l.bf16 %v259_v7 }
 0x4ba   :  { %v3839_v8 = vpop.f32.mrf.mxu0 }
 0x4bc   :  { %v2305_v29 = vpop.f32.mrf.mxu0 }
 0x4bd   :  { %3893 = vmatprep.mubr.msk.f32.mxu0 %vm1388_vm0, %v2305_v29  ;;  %v284_v29 = vunpack.c.l.bf16 %v258_v27 }
 0x4be   :  { %v3853_v31 = vpop.f32.mrf.mxu1  ;;  %3894 = vmatmul.mubr.msk.f32.vlgmr.msra.gmra.mxu0 %vm1388_vm0, %v3839_v8  ;;  %v285_v8 = vunpack.c.h.bf16 %v258_v27 }
 0x4bf   :  { %2865 = vmatpush1.msra.mxu0 %v294_v37  ;;  %v254_v37 = vld [vmem:[#allocation10 + $0x30] sm:$0xff] }
 0x4c0   :  { %v2402_v1 = vpop.f32.mrf.mxu1  ;;  %2866 = vmatprep.subr.mxu0 %v293_v17  ;;  %v277_v38 = vunpack.c.h.bf16 %v254_v37  ;;  %v276_v17 = vunpack.c.l.bf16 %v254_v37 }
 0x4c1   :  { %3907 = vmatprep.mubr.msk.f32.mxu1 %vm1388_vm0, %v2402_v1  ;;  %2867 = vmatpush1.msra.mxu0 %v292_v22  ;;  %v253_v22 = vld [vmem:[#allocation10 + $0x28] sm:$0xff] }
 0x4c2   :  { %v3842_v3 = vpop.f32.mrf.mxu0  ;;  %3908 = vmatmul.mubr.msk.f32.vlgmr.msra.gmra.mxu1 %vm1388_vm0, %v3853_v31  ;;  %2868 = vmatprep.subr.mxu0 %v291_v19  ;;  %v257_v31 = vld [vmem:[#allocation10 + $0x48] sm:$0xff]  ;;  %v275_v33 = vunpack.c.h.bf16 %v253_v22  ;;  %v274_v19 = vunpack.c.l.bf16 %v253_v22 }
 0x4c3   :  { %2869 = vmatpush1.msra.mxu0 %v290_v24  ;;  %v283_v1 = vunpack.c.h.bf16 %v257_v31  ;;  %v252_v24 = vld [vmem:[#allocation10 + $0x20] sm:$0xff] }
 0x4c4   :  { %v2315_v36 = vpop.f32.mrf.mxu0  ;;  %2870 = vmatprep.subr.mxu0 %v289_v26  ;;  %v251_v26 = vld [vmem:[#allocation10 + $0x18] sm:$0xff] }
 0x4c5   :  { %3896 = vmatprep.mubr.msk.f32.mxu0 %vm1388_vm0, %v2315_v36  ;;  %2871 = vmatpush1.msra.mxu0 %v288_v42  ;;  %v256_v36 = vld [vmem:[#allocation10 + $0x40] sm:$0xff]  ;;  %v250_v42 = vld [vmem:[#allocation10 + $0x10] sm:$0xff] }
 0x4c6   :  { %v3856_v13 = vpop.f32.mrf.mxu1  ;;  %3897 = vmatmul.mubr.msk.f32.gmra.mxu0 %vm1388_vm0, %v3842_v3  ;;  %2872 = vmatprep.subr.mxu0 %v287_v16  ;;  %v282_v3 = vunpack.c.l.bf16 %v257_v31 }
 0x4c7   :  { %2873 = vmatpush1.msra.mxu0 %v286_v25  ;;  %v3364_v25 = vld [vmem:[#allocation11 + $0x38] sm:$0xff]  }
 0x4c8   :  { %v2412_v21 = vpop.f32.mrf.mxu1  ;;  %2874 = vmatprep.subr.mxu0 %v285_v8  ;;  %v3327_v27 = vunpack.c.h.bf16 %v3364_v25  ;;  %v3326_v8 = vunpack.c.l.bf16 %v3364_v25 }
 0x4c9   :  { %3910 = vmatprep.mubr.msk.f32.mxu1 %vm1388_vm0, %v2412_v21  ;;  %2875 = vmatpush1.msra.mxu0 %v284_v29  ;;  %v281_v21 = vunpack.c.h.bf16 %v256_v36  ;;  %v3363_v29 = vld [vmem:[#allocation11 + $0x30] sm:$0xff]  }
 0x4ca   :  { %3911 = vmatmul.mubr.msk.f32.gmra.mxu1 %vm1388_vm0, %v3856_v13  ;;  %2876 = vmatprep.subr.mxu0 %v283_v1  ;;  %v280_v13 = vunpack.c.l.bf16 %v256_v36  ;;  %v3323_v31 = vunpack.c.h.bf16 %v3363_v29  ;;  %v3322_v1 = vunpack.c.l.bf16 %v3363_v29 }
 0x4cb   :  { %2877 = vmatpush1.msra.mxu0 %v282_v3  ;;  %3913 = vmatprep.subr.mxu1 %v3327_v27  ;;  %v3362_v3 = vld [vmem:[#allocation11 + $0x28] sm:$0xff]  }
 0x4cc   :  { %2878 = vmatprep.subr.mxu0 %v281_v21  ;;  %3914 = vmatpush3.msra.mxu1 %v3327_v27  ;;  %v3319_v36 = vunpack.c.h.bf16 %v3362_v3  ;;  %v3361_v21 = vld [vmem:[#allocation11 + $0x20] sm:$0xff]  }
 0x4cd   :  { %2879 = vmatpush1.msra.mxu0 %v280_v13  ;;  %3915 = vmatprep.subr.mxu1 %v3326_v8  ;;  %v3318_v13 = vunpack.c.l.bf16 %v3362_v3  ;;  %v3315_v9 = vunpack.c.h.bf16 %v3361_v21 }
 0x4ce   :  { %2880 = vmatprep.subr.mxu0 %v279_v23  ;;  %3916 = vmatpush3.msra.mxu1 %v3326_v8  ;;  %v3314_v23 = vunpack.c.l.bf16 %v3361_v21 }
 0x4cf   :  { %2881 = vmatpush1.msra.mxu0 %v278_v14  ;;  %3917 = vmatprep.subr.mxu1 %v3323_v31  ;;  %v3360_v14 = vld [vmem:[#allocation11 + $0x18] sm:$0xff]  }
 0x4d0   :  { %2882 = vmatprep.subr.mxu0 %v277_v38  ;;  %3918 = vmatpush3.msra.mxu1 %v3323_v31  ;;  %v3311_v37 = vunpack.c.h.bf16 %v3360_v14  ;;  %v3310_v38 = vunpack.c.l.bf16 %v3360_v14 }
 0x4d1   :  { %2883 = vmatpush1.msra.mxu0 %v276_v17  ;;  %3919 = vmatprep.subr.mxu1 %v3322_v1  ;;  %v3359_v17 = vld [vmem:[#allocation11 + $0x10] sm:$0xff]  }
 0x4d2   :  { %2884 = vmatprep.subr.mxu0 %v275_v33  ;;  %3920 = vmatpush3.msra.mxu1 %v3322_v1  ;;  %v3307_v22 = vunpack.c.h.bf16 %v3359_v17  ;;  %v3306_v33 = vunpack.c.l.bf16 %v3359_v17 }
 0x4d3   :  { %2885 = vmatpush1.msra.mxu0 %v274_v19  ;;  %3921 = vmatprep.subr.mxu1 %v3319_v36  ;;  %v3358_v19 = vld [vmem:[#allocation11 + $0x8] sm:$0xff]  }
 0x4d4   :  { %3922 = vmatpush3.msra.mxu1 %v3319_v36 }
 0x4d5   :  { %3923 = vmatprep.subr.mxu1 %v3318_v13 }
 0x4d6   :  { %3924 = vmatpush3.msra.mxu1 %v3318_v13 }
 0x4d7   :  { %3925 = vmatprep.subr.mxu1 %v3315_v9 }
 0x4d8   :  { %3926 = vmatpush3.msra.mxu1 %v3315_v9 }
 0x4d9   :  { %3927 = vmatprep.subr.mxu1 %v3314_v23 }
 0x4da   :  { %3928 = vmatpush3.msra.mxu1 %v3314_v23 }
 0x4db   :  { %3929 = vmatprep.subr.mxu1 %v3311_v37 }
 0x4dc   :  { %3930 = vmatpush3.msra.mxu1 %v3311_v37 }
 0x4dd   :  { %3931 = vmatprep.subr.mxu1 %v3310_v38 }
 0x4de   :  { %3932 = vmatpush3.msra.mxu1 %v3310_v38 }
 0x4df   :  { %3933 = vmatprep.subr.mxu1 %v3307_v22 }
 0x4e0   :  { %3934 = vmatpush3.msra.mxu1 %v3307_v22 }
 0x4e1   :  { %3935 = vmatprep.subr.mxu1 %v3306_v33 }
 0x4e2   :  { %3936 = vmatpush3.msra.mxu1 %v3306_v33 }
 0x56c   :  { %v3867_v18 = vpop.f32.mrf.mxu0 }
 0x56e   :  { %v2499_v28 = vpop.f32.mrf.mxu0 }
 0x570   :  { %v3881_v43 = vpop.f32.mrf.mxu1 }
 0x571   :  { %v2812_v30 = vadd.f32 %v3881_v43, %v3867_v18  ;;  %v272_v18 = vunpack.c.l.bf16 %v252_v24  ;;  %v271_v43 = vunpack.c.h.bf16 %v251_v26 }
 0x572   :  { %v2596_v40 = vpop.f32.mrf.mxu1 }
 0x573   :  { %v2809_v46 = vadd.f32 %v2596_v40, %v2499_v28  ;;  %v273_v28 = vunpack.c.h.bf16 %v252_v24  ;;  %v270_v40 = vunpack.c.l.bf16 %v251_v26  ;;  %v3303_v24 = vunpack.c.h.bf16 %v3358_v19 }
 0x574   :  { %v3302_v26 = vunpack.c.l.bf16 %v3358_v19 }
 0x575   :  { %v3870_v44 = vpop.f32.mrf.mxu0  ;;  %2886 = vmatprep.subr.mxu0 %v273_v28  ;;  %3937 = vmatprep.subr.mxu1 %v3303_v24 }
 0x576   :  { %2887 = vmatpush1.msra.mxu0 %v272_v18  ;;  %3938 = vmatpush3.msra.mxu1 %v3303_v24 }
 0x577   :  { %v2509_v20 = vpop.f32.mrf.mxu0  ;;  %2888 = vmatprep.subr.mxu0 %v271_v43  ;;  %3939 = vmatprep.subr.mxu1 %v3302_v26 }
 0x578   :  { %v3884_v48 = vpop.f32.mrf.mxu1  ;;  %2889 = vmatpush1.msra.mxu0 %v270_v40  ;;  %3940 = vmatpush3.msra.mxu1 %v3302_v26 }
 0x579   :  { %v2818_v60 = vadd.f32 %v3884_v48, %v3870_v44  ;;  %v4223_v44 = vmov 0.0   ;;  %v269_v48 = vunpack.c.h.bf16 %v250_v42 }
 0x57a   :  { %v2606_v49 = vpop.f32.mrf.mxu1  ;;  %2928 = vmatprep.mubr.f32.mxu0 %v4223_v44 }
 0x57b   :  { %v2815_v45 = vadd.f32 %v2606_v49, %v2509_v20  ;;  %v249_v20 = vld [vmem:[#allocation10 + $0x8] sm:$0xff]  ;;  %2890 = vmatprep.subr.mxu0 %v269_v48 }
 0x57c   :  { %v267_v49 = vunpack.c.h.bf16 %v249_v20 }
 0x57e   :  { %v3895_v47 = vpop.f32.mrf.mxu0 }
 0x57f   :  { %v2813_v53 = vadd.f32 %v3895_v47, %v2812_v30  ;;  %v268_v47 = vunpack.c.l.bf16 %v250_v42  ;;  %v248_v30 = vld [vmem:[#allocation10] sm:$0xff] }
 0x580   :  { %v2693_v51 = vpop.f32.mrf.mxu0  ;;  %v3297_v42 = vld [vmem:[#allocation11] sm:$0xff]  }
 0x581   :  { %v2810_v50 = vadd.f32 %v2809_v46, %v2693_v51  ;;  %v266_v51 = vunpack.c.l.bf16 %v249_v20  ;;  %v265_v46 = vunpack.c.h.bf16 %v248_v30  ;;  %2891 = vmatpush1.msra.mxu0 %v268_v47  ;;  %v3299_v18 = vunpack.c.h.bf16 %v3297_v42 }
 0x582   :  { %v3909_v32 = vpop.f32.mrf.mxu1  ;;  %2892 = vmatprep.subr.mxu0 %v267_v49  ;;  %v3298_v28 = vunpack.c.l.bf16 %v3297_v42 }
 0x583   :  { %v2814_v55 = vadd.f32 %v3909_v32, %v2813_v53  ;;  %v264_v53 = vunpack.c.l.bf16 %v248_v30  ;;  %2893 = vmatpush1.msra.mxu0 %v266_v51  ;;  %3941 = vmatprep.subr.mxu1 %v3299_v18 }
 0x584   :  { %v2790_v57 = vpop.f32.mrf.mxu1  ;;  %2894 = vmatprep.subr.mxu0 %v265_v46  ;;  %3942 = vmatpush3.msra.mxu1 %v3299_v18 }
 0x585   :  { %v4675_v35 = vadd.f32 %v4059_v34, %v2814_v55  ;;  %v2811_v59 = vadd.f32 %v2810_v50, %v2790_v57  ;;  %2895 = vmatpush1.msra.mxu0 %v264_v53  ;;  %3943 = vmatprep.subr.mxu1 %v3298_v28 }
 0x586   :  { %v3898_v39 = vpop.f32.mrf.mxu0  ;;  %3944 = vmatpush3.msra.mxu1 %v3298_v28 }
 0x587   :  { %v4677_v41 = vadd.f32 %v4060_v61, %v2811_v59  ;;  %v2827_v62 = vmul.f32 %v4675_v35, %v4675_v35  ;;  %v2819_v0 = vadd.f32 %v3898_v39, %v2818_v60 }
 0x588   :  { %v2703_v63 = vpop.f32.mrf.mxu0 }
 0x589   :  { %2832 = vadd.xlane.f32.xlu1 %v2827_v62  ;;  %v2826_v52 = vmul.f32 %v4677_v41, %v4677_v41  ;;  %v2816_v54 = vadd.f32 %v2815_v45, %v2703_v63 }
 0x58a   :  { %v3912_v2 = vpop.f32.mrf.mxu1 }
 0x58b   :  { %v2820_v4 = vadd.f32 %v3912_v2, %v2819_v0  ;;  %2830 = vadd.xlane.f32.xlu0 %v2826_v52 }
 0x58c   :  { %v2800_v56 = vpop.f32.mrf.mxu1 }
 0x58d   :  { %v4683_v58 = vadd.f32 %v4061_v6, %v2820_v4  ;;  %v2817_v10 = vadd.f32 %v2816_v54, %v2800_v56  ;;  %v3163_v54 = vld [vmem:[%s4715_s7] ss:$0 sm:$0xff]  ;;  %s4224_s7 = smov [#allocation13]  }
 0x58e   :  { %s3083_s16 = sshll.u32 %s4224_s7, 4  ;;  %s3084_s16 = int_to_ptr.vmem [resolvable:$true] %s3083_s16 }
 0x58f   :  { %v4685_v5 = vadd.f32 %v4062_v11, %v2817_v10  ;;  %v2829_v12 = vmul.f32 %v4683_v58, %v4683_v58  ;;  %s4183_s17 = scalar_lea.vmem %s3084_s16, 512  ;;  %p4188_p3 = scmp.lt.s32.totalorder %s3084_s16, %s3084_s16 }
 0x590   :  { %p4184_p2 = scmp.ne.s32.totalorder %s3084_s16, %s4183_s17  ;;  %p4189_p4 = scmp.lt.s32.totalorder %s4183_s17, %s4183_s17 }
 0x591   :  { %2836 = vadd.xlane.f32.xlu1 %v2829_v12  ;;  %v2828_v15 = vmul.f32 %v4685_v5, %v4685_v5 }
 0x592   :  { %p4190_p5 = por %p4189_p4, %p4188_p3 }
 0x593   :  { %2834 = vadd.xlane.f32.xlu0 %v2828_v15 }
 0x594   :  { %p4191_p6 = pnand %p4190_p5, %p4184_p2 }
 0x612   :  { %v2833_v32 = vpop.xlane.xlu1 %2832 }
 0x613   :  { %v2839_v50 = vmul.f32 0.0078125, %v2833_v32 }
 0x614   :  { %v2831_v55 = vpop.xlane.xlu0 %2830 }
 0x615   :  { %v2843_v57 = vadd.f32 1e-05, %v2839_v50  ;;  %v2838_v34 = vmul.f32 0.0078125, %v2831_v55 }
 0x617   :  { %v2842_v59 = vadd.f32 1e-05, %v2838_v34  ;;  %4035 = vrsqrt.f32 %v2843_v57 }
 0x619   :  { %4037 = vrsqrt.f32 %v2842_v59 }
 0x61a   :  { %v2837_v39 = vpop.xlane.xlu1 %2836 }
 0x61b   :  { %v2841_v60 = vmul.f32 0.0078125, %v2837_v39 }
 0x61c   :  { %v2835_v61 = vpop.xlane.xlu0 %2834 }
 0x61d   :  { %v2845_v62 = vadd.f32 1e-05, %v2841_v60  ;;  %v2840_v63 = vmul.f32 0.0078125, %v2835_v61 }
 0x61f   :  { %v2844_v45 = vadd.f32 1e-05, %v2840_v63  ;;  %4039 = vrsqrt.f32 %v2845_v62 }
 0x621   :  { %4041 = vrsqrt.f32 %v2844_v45 }
 0x624   :  { %v4036_v0 = vpop.eup %4035 }
 0x625   :  { %v2851_v56 = vmul.f32 %v4036_v0, %v4675_v35 }
 0x626   :  { %v4038_v52 = vpop.eup %4037 }
 0x627   :  { %v2850_v2 = vmul.f32 %v4038_v52, %v4677_v41  ;;  %v2861_v10 = vmul.f32 %v3163_v54, %v2851_v56 }
 0x629   :  { %v2860_v4 = vmul.f32 %v3163_v54, %v2850_v2 }
 0x62b   :  { %2929 = vmatmul.mubr.f32.vlgmr.msra.gmra.mxu0 %v2860_v4 }
 0x62c   :  { %2934 = vmatprep.mubr.f32.mxu0 %v4223_v44  ;;  %v4040_v6 = vpop.eup %4039 }
 0x62d   :  { %v2853_v7 = vmul.f32 %v4040_v6, %v4683_v58 }
 0x62e   :  { %v4042_v11 = vpop.eup %4041 }
 0x62f   :  { %2935 = vmatmul.mubr.f32.gmra.mxu0 %v2861_v10  ;;  %v2852_v12 = vmul.f32 %v4042_v11, %v4685_v5  ;;  %v2863_v16 = vmul.f32 %v3163_v54, %v2853_v7 }
 0x630   :  { %2940 = vmatprep.mubr.f32.mxu0 %v4223_v44 }
 0x631   :  { %v2862_v15 = vmul.f32 %v3163_v54, %v2852_v12 }
 0x633   :  { %2941 = vmatmul.mubr.f32.gmra.mxu0 %v2862_v15 }
 0x634   :  { %2946 = vmatprep.mubr.f32.mxu0 %v4223_v44 }
 0x637   :  { %2947 = vmatmul.mubr.f32.gmra.mxu0 %v2863_v16 }
 0x6eb   :  { %v2930_v43 = vpop.f32.mrf.mxu0 }
 0x6ec   :  { %v3164_v44 = vmul.f32 -1.442695, %v2930_v43 }
 0x6ed   :  { %v2932_v40 = vpop.f32.mrf.mxu0 }
 0x6ee   :  { %4043 = vpow2.f32 %v3164_v44 }
 0x6ef   :  { %v2936_v20 = vpop.f32.mrf.mxu0 }
 0x6f0   :  { %v3165_v48 = vmul.f32 -1.442695, %v2936_v20 }
 0x6f1   :  { %v2938_v47 = vpop.f32.mrf.mxu0 }
 0x6f2   :  { %4045 = vpow2.f32 %v3165_v48 }
 0x6f3   :  { %v2942_v30 = vpop.f32.mrf.mxu0 }
 0x6f4   :  { %v3166_v49 = vmul.f32 -1.442695, %v2942_v30 }
 0x6f5   :  { %v2944_v51 = vpop.f32.mrf.mxu0 }
 0x6f6   :  { %4047 = vpow2.f32 %v3166_v49 }
 0x6f7   :  { %v2948_v46 = vpop.f32.mrf.mxu0 }
 0x6f8   :  { %v3167_v53 = vmul.f32 -1.442695, %v2948_v46 }
 0x6f9   :  { %v2950_v10 = vpop.f32.mrf.mxu0 }
 0x6fa   :  { %4049 = vpow2.f32 %v3167_v53 }
 0x6fb   :  { %v4044_v32 = vpop.eup %4043 }
 0x6fc   :  { %v2965_v50 = vadd.f32 1.0, %v4044_v32 }
 0x6fe   :  { %4051 = vrcp.f32 %v2965_v50 }
 0x6ff   :  { %v4046_v55 = vpop.eup %4045 }
 0x700   :  { %v2966_v57 = vadd.f32 1.0, %v4046_v55 }
 0x702   :  { %4053 = vrcp.f32 %v2966_v57 }
 0x703   :  { %v4048_v34 = vpop.eup %4047 }
 0x704   :  { %v2967_v59 = vadd.f32 1.0, %v4048_v34 }
 0x706   :  { %4055 = vrcp.f32 %v2967_v59 }
 0x707   :  { %v4050_v39 = vpop.eup %4049 }
 0x708   :  { %v2968_v60 = vadd.f32 1.0, %v4050_v39 }
 0x70a   :  { %4057 = vrcp.f32 %v2968_v60 }
 0x70b   :  { %v4052_v61 = vpop.eup %4051 }
 0x70c   :  { %v2977_v62 = vmul.f32 %v4052_v61, %v2930_v43 }
 0x70e   :  { %v2981_v63 = vmul.f32 %v2977_v62, %v2932_v40 }
 0x70f   :  { %v4054_v45 = vpop.eup %4053 }
 0x710   :  { %v2978_v0 = vmul.f32 %v4054_v45, %v2936_v20  ;;  %3945 = vmatprep.mubr.f32.mxu1 %v2981_v63 }
 0x712   :  { %v2982_v52 = vmul.f32 %v2978_v0, %v2938_v47 }
 0x713   :  { %v4056_v2 = vpop.eup %4055 }
 0x714   :  { %v2979_v54 = vmul.f32 %v4056_v2, %v2942_v30  ;;  %3946 = vmatmul.mubr.f32.vlgmr.msra.gmra.mxu1 %v2982_v52 }
 0x716   :  { %v2983_v4 = vmul.f32 %v2979_v54, %v2944_v51 }
 0x717   :  { %v4058_v56 = vpop.eup %4057 }
 0x718   :  { %v2980_v6 = vmul.f32 %v4058_v56, %v2948_v46  ;;  %3948 = vmatprep.mubr.f32.mxu1 %v2983_v4 }
 0x71a   :  { %v2984_v11 = vmul.f32 %v2980_v6, %v2950_v10 }
 0x71c   :  { %3949 = vmatmul.mubr.f32.gmra.mxu1 %v2984_v11 }
 0x7d4   :  { %v3947_v12 = vpop.f32.mrf.mxu1 }
 0x7d5   :  { %v3071_v15 = vadd.f32 %v3947_v12, %v4675_v35 }
 0x7d6   :  { %v3051_v7 = vpop.f32.mrf.mxu1 }
 0x7d7   :  { %3075 = vst [vmem:[#allocation13 + $0x8] sm:$0xff] %v3071_v15  ;;  %v3070_v16 = vadd.f32 %v3051_v7, %v4677_v41 }
 0x7d9   :  { %3074 = vst [vmem:[#allocation13] sm:$0xff] %v3070_v16 }
 0x7dc   :  { %v3950_v25 = vpop.f32.mrf.mxu1 }
 0x7dd   :  { %v3073_v27 = vadd.f32 %v3950_v25, %v4683_v58 }
 0x7de   :  { %v3061_v8 = vpop.f32.mrf.mxu1 }
 0x7df   :  { %3077 = vst [vmem:[#allocation13 + $0x18] sm:$0xff] %v3073_v27  ;;  %v3072_v29 = vadd.f32 %v3061_v8, %v4685_v5 }
 0x7e1   :  { %3076 = vst [vmem:[#allocation13 + $0x10] sm:$0xff] %v3072_v29 }
 0x7e2   :  { %4194 = shalt.err (!%p4191_p6)
}
 0x7e3   :  { %3089 = dma.vmem_to_hbm [thread:$0]  %s3084_s16, 512, %s4716_s8, [#allocation4], %s4214_s30, %s4214_s30, %s4215_s9  }
 0x7e4   :  { %4211 = dma.done.wait [#allocation4], 512  }
 0x7e5   :  { %4212 = vsyncadd [#allocation4], 4294966784 }
 0x7e6   :  { %3093 = vsyncpa [#allocation3], 1 }
 0x7e7   :  { %3094 = vsyncpa [#allocation6], 1 }
 0x7e8   :  { %3095 = vsyncpa [#allocation9], 1 }
 0x7e9   :  { %3096 = vsyncpa [#allocation12], 1 }
 0x7ea   :  { %3097 = vsyncpa [#allocation4], 1 }

</bundles_post_ra>
